<compile_context>
chip_gen: v5e
topology: v5e:2x2
jax: 0.10.0
libtpu: 0.0.40
codegen_flags: <defaults>
</compile_context>

<pallas_src>
import functools

import jax
import jax.numpy as jnp
import numpy as np
from jax.experimental import pallas as pl
from jax.experimental.pallas import tpu as pltpu


# ----------------------------------------------------------------------------
# In-kernel building blocks
# ----------------------------------------------------------------------------
def _conv2_bn2_residual(out1, sc, o1_ref, w2_ref, s2_ref, b2_ref, out_ref,
                        bs, ho, wo, planes):
    """conv2 (3x3, pad=1, stride=1) + bn2 + relu, then residual add + relu.

    out1 : (bs*ho*wo, planes) f32  conv1 output of this block of samples.
    sc   : (bs*ho*wo, planes) f32  shortcut branch (already BN'd if projected).
    o1_ref: (bs, ho+2, wo+2, planes) VMEM scratch, zero-padded staging of out1.
    """
    m = bs * ho * wo

    # Zero only the thin padding ring (megacore-safe, see header comment).
    zrow = jnp.zeros((bs, 1, wo + 2, planes), jnp.float32)
    zcol = jnp.zeros((bs, ho + 2, 1, planes), jnp.float32)
    o1_ref[:, 0:1, :, :] = zrow
    o1_ref[:, ho + 1:ho + 2, :, :] = zrow
    o1_ref[:, :, 0:1, :] = zcol
    o1_ref[:, :, wo + 1:wo + 2, :] = zcol

    # Interior is fully overwritten each grid step (never leaves the chip).
    o1_ref[:, 1:ho + 1, 1:wo + 1, :] = out1.reshape(bs, ho, wo, planes)

    def o1_tap(kh, kw):
        return o1_ref[:, kh:kh + ho, kw:kw + wo, :].reshape(m, planes)

    def w2_tap(t):  # (9*planes, planes): sublane-aligned per-tap row slices
        return w2_ref[t * planes:(t + 1) * planes, :]

    acc = jnp.dot(o1_tap(0, 0), w2_tap(0), preferred_element_type=jnp.float32)
    for t in range(1, 9):
        kh, kw = divmod(t, 3)
        acc = acc + jnp.dot(o1_tap(kh, kw), w2_tap(t),
                            preferred_element_type=jnp.float32)
    out2 = jnp.maximum(acc * s2_ref[...] + b2_ref[...], 0.0)

    out_ref[...] = jnp.maximum(out2 + sc, 0.0)


def _bb_kernel_direct(xp_ref, w1_ref, s1_ref, b1_ref, w2_ref, s2_ref, b2_ref,
                      *rest, bs, h, w, cin, planes, proj):
    """stride=1 path: conv1 taps are built in-kernel from the padded input
    block (no wrapper im2col, no 9x HBM read amplification).

    xp_ref : (bs, h+2, w+2, cin) zero-padded NHWC input block.
    w1_ref : (9*cin, planes) conv1 weights, rows ordered (kh, kw, cin).
    w2_ref : (9*planes, planes) conv2 weights, rows ordered (kh, kw, cin).
    proj=True : rest = (wsc_ref, ssc_ref, bsc_ref, out_ref, o1_ref)
    proj=False: rest = (out_ref, o1_ref);  shortcut = identity = centre tap.
    """
    if proj:
        wsc_ref, ssc_ref, bsc_ref, out_ref, o1_ref = rest
    else:
        out_ref, o1_ref = rest
    m = bs * h * w

    def x_tap(kh, kw):
        return xp_ref[:, kh:kh + h, kw:kw + w, :].reshape(m, cin)

    def w1_tap(t):
        return w1_ref[t * cin:(t + 1) * cin, :]

    # The centre tap doubles as the (pre-projection) shortcut input.
    center = x_tap(1, 1)

    acc = jnp.dot(x_tap(0, 0), w1_tap(0), preferred_element_type=jnp.float32)
    for t in range(1, 9):
        kh, kw = divmod(t, 3)
        tap = center if t == 4 else x_tap(kh, kw)
        acc = acc + jnp.dot(tap, w1_tap(t), preferred_element_type=jnp.float32)
    out1 = jnp.maximum(acc * s1_ref[...] + b1_ref[...], 0.0)

    if proj:  # 1x1 projection shortcut (stride=1, cin != planes)
        sc = jnp.dot(center, wsc_ref[...], preferred_element_type=jnp.float32)
        sc = sc * ssc_ref[...] + bsc_ref[...]
    else:     # identity shortcut (cin == planes)
        sc = center

    _conv2_bn2_residual(out1, sc, o1_ref, w2_ref, s2_ref, b2_ref, out_ref,
                        bs, h, w, planes)


def _bb_kernel_im2col(x1c_ref, w1_ref, s1_ref, b1_ref, w2_ref, s2_ref, b2_ref,
                      out_ref, o1_ref, *, bs, ho, wo, planes):
    """stride>1 (projection) path: conv1 is ONE K=9*cin matmul on the
    wrapper im2col, and the 1x1 projection shortcut is folded into the same
    matmul (w1_ref has 2*planes output columns = [conv1 | shortcut]), so no
    separate shortcut input stream / extra K=cin matmul is needed."""
    m = bs * ho * wo
    y = jnp.dot(x1c_ref[...], w1_ref[...], preferred_element_type=jnp.float32)
    y = y * s1_ref[...] + b1_ref[...]           # widened (1, 2*planes) affine
    out1 = jnp.maximum(y[:, :planes], 0.0)      # conv1 + bn1 + relu
    sc = y[:, planes:]                          # 1x1 shortcut + bn (no relu)
    _conv2_bn2_residual(out1, sc, o1_ref, w2_ref, s2_ref, b2_ref, out_ref,
                        bs, ho, wo, planes)


# ----------------------------------------------------------------------------
# Wrapper (layout glue + pallas_call)
# ----------------------------------------------------------------------------
def _im2col_3x3(x, stride):
    """NHWC input, 3x3 kernel, pad=1 -> (N*Ho*Wo, 9*C), feature order (kh,kw,c)."""
    n, h, w, c = x.shape
    ho = (h - 1) // stride + 1
    wo = (w - 1) // stride + 1
    xp = jnp.pad(x, ((0, 0), (1, 1), (1, 1), (0, 0)))
    taps = [xp[:, kh:kh + (ho - 1) * stride + 1:stride,
               kw:kw + (wo - 1) * stride + 1:stride, :]
            for kh in range(3) for kw in range(3)]
    return jnp.concatenate(taps, axis=-1).reshape(n * ho * wo, 9 * c)


def _pick_block_batch(n, m_per, target_rows=512, max_b=32):
    """Samples per grid step: aim for >=512 output rows/step to amortize grid
    overhead, but keep the grid length >= 2 so ('parallel',) can still split
    across both TensorCores on v7x."""
    b = max(1, min(max_b, target_rows // max(1, m_per)))
    if n >= 2:
        b = min(b, n // 2)
    b = max(1, min(b, n))
    while n % b:
        b -= 1
    return b


@functools.partial(jax.jit, static_argnums=2)
def basic_block_forward(x_nchw, params, stride):
    x = jnp.transpose(x_nchw, (0, 2, 3, 1)).astype(jnp.float32)   # NCHW -> NHWC
    n, h, w, cin = x.shape
    planes = params["s1"].shape[-1]
    proj = (stride > 1) or (cin != planes)
    ho = (h - 1) // stride + 1
    wo = (w - 1) // stride + 1
    m_per = ho * wo
    b = _pick_block_batch(n, m_per)
    assert (b * m_per) % 8 == 0, "rows per grid step must be a multiple of 8"

    def const2d(shape):
        return pl.BlockSpec(shape, lambda i: (0, 0))

    if stride == 1:
        xp = jnp.pad(x, ((0, 0), (1, 1), (1, 1), (0, 0)))   # 1.27x reads only
        inputs = [xp, params["w1"], params["s1"], params["b1"],
                  params["w2"], params["s2"], params["b2"]]
        in_specs = [
            pl.BlockSpec((b, h + 2, w + 2, cin), lambda i: (i, 0, 0, 0)),
            const2d((9 * cin, planes)),
            const2d((1, planes)), const2d((1, planes)),
            const2d((9 * planes, planes)),
            const2d((1, planes)), const2d((1, planes)),
        ]
        if proj:
            inputs += [params["wsc"], params["ssc"], params["bsc"]]
            in_specs += [const2d((cin, planes)),
                         const2d((1, planes)), const2d((1, planes))]
        kernel = functools.partial(_bb_kernel_direct, bs=b, h=h, w=w,
                                   cin=cin, planes=planes, proj=proj)
    else:
        # stride > 1 always uses the projection shortcut in this module.
        x1c = _im2col_3x3(x, stride)                        # (n*m_per, 9*cin)
        # Fold the 1x1 projection into conv1's weight: its input is exactly the
        # centre tap (rows 4*cin:5*cin of the im2col feature axis).
        wsc_embed = jnp.zeros((9 * cin, planes), jnp.float32)
        wsc_embed = wsc_embed.at[4 * cin:5 * cin, :].set(params["wsc"])
        w1wide = jnp.concatenate([params["w1"], wsc_embed], axis=1)
        s1wide = jnp.concatenate([params["s1"], params["ssc"]], axis=1)
        b1wide = jnp.concatenate([params["b1"], params["bsc"]], axis=1)
        inputs = [x1c, w1wide, s1wide, b1wide,
                  params["w2"], params["s2"], params["b2"]]
        in_specs = [
            pl.BlockSpec((b * m_per, 9 * cin), lambda i: (i, 0)),
            const2d((9 * cin, 2 * planes)),
            const2d((1, 2 * planes)), const2d((1, 2 * planes)),
            const2d((9 * planes, planes)),
            const2d((1, planes)), const2d((1, planes)),
        ]
        kernel = functools.partial(_bb_kernel_im2col, bs=b, ho=ho, wo=wo,
                                   planes=planes)

    out_flat = pl.pallas_call(
        kernel,
        out_shape=jax.ShapeDtypeStruct((n * m_per, planes), jnp.float32),
        grid=(n // b,),
        in_specs=in_specs,
        out_specs=pl.BlockSpec((b * m_per, planes), lambda i: (i, 0)),
        scratch_shapes=[pltpu.VMEM((b, ho + 2, wo + 2, planes), jnp.float32)],
        compiler_params=pltpu.CompilerParams(
            dimension_semantics=("parallel",),          # megacore split on v7x
            vmem_limit_bytes=48 * 1024 * 1024),         # headroom for larger b
    )(*inputs)

    out = out_flat.reshape(n, ho, wo, planes)
    return jnp.transpose(out, (0, 3, 1, 2))               # NHWC -> NCHW


# ----------------------------------------------------------------------------
# Deterministic parameter init + pure-JAX reference
# ----------------------------------------------------------------------------
def _fold_bn(gamma, beta, mean, var, eps=1e-5):
    scale = gamma / jnp.sqrt(var + eps)
    bias = beta - mean * scale
    return scale.reshape(1, -1), bias.reshape(1, -1)


def init_params(key, in_planes, planes, stride):
    ks = jax.random.split(key, 12)

    def bn_raw(k0, k1, k2, k3, c):
        gamma = 0.5 + jax.random.uniform(k0, (c,), jnp.float32)
        beta = 0.1 * jax.random.normal(k1, (c,), jnp.float32)
        mean = 0.1 * jax.random.normal(k2, (c,), jnp.float32)
        var = 0.5 + jax.random.uniform(k3, (c,), jnp.float32)
        return gamma, beta, mean, var

    w1 = 0.1 * jax.random.normal(ks[0], (3, 3, in_planes, planes), jnp.float32)  # HWIO
    w2 = 0.1 * jax.random.normal(ks[1], (3, 3, planes, planes), jnp.float32)
    bn1 = bn_raw(ks[2], ks[3], ks[4], ks[5], planes)
    bn2 = bn_raw(ks[6], ks[7], ks[8], ks[9], planes)
    s1, b1 = _fold_bn(*bn1)
    s2, b2 = _fold_bn(*bn2)
    params = {
        "w1_hwio": w1, "w2_hwio": w2,
        "w1": w1.reshape(9 * in_planes, planes),   # rows ordered (kh, kw, cin)
        "w2": w2.reshape(9 * planes, planes),      # rows ordered (kh, kw, cin)
        "s1": s1, "b1": b1, "s2": s2, "b2": b2,
        "bn1": bn1, "bn2": bn2,
    }
    if (stride > 1) or (in_planes != planes):
        wsc = 0.1 * jax.random.normal(ks[10], (in_planes, planes), jnp.float32)
        bnsc = bn_raw(*jax.random.split(ks[11], 4), planes)
        ssc, bsc = _fold_bn(*bnsc)
        params.update({
            "wsc": wsc,
            "wsc_hwio": wsc.reshape(1, 1, in_planes, planes),
            "ssc": ssc, "bsc": bsc, "bnsc": bnsc,
        })
    return params


def _conv_ref(x, w_hwio, stride, padding):
    return jax.lax.conv_general_dilated(
        x, w_hwio, (stride, stride), padding,
        dimension_numbers=("NHWC", "HWIO", "NHWC"))


def basic_block_ref(x_nchw, params, stride):
    x = jnp.transpose(x_nchw, (0, 2, 3, 1)).astype(jnp.float32)

    def bn(y, stats, eps=1e-5):
        g, b, m, v = stats
        return (y - m) / jnp.sqrt(v + eps) * g + b

    out = jax.nn.relu(bn(_conv_ref(x, params["w1_hwio"], stride, ((1, 1), (1, 1))),
                         params["bn1"]))
    out = jax.nn.relu(bn(_conv_ref(out, params["w2_hwio"], 1, ((1, 1), (1, 1))),
                         params["bn2"]))
    if "wsc" in params:
        sc = bn(_conv_ref(x, params["wsc_hwio"], stride, ((0, 0), (0, 0))),
                params["bnsc"])
    else:
        sc = x
    y = jax.nn.relu(sc + out)
    return jnp.transpose(y, (0, 3, 1, 2))


# ----------------------------------------------------------------------------
if __name__ == "__main__":
    key = jax.random.PRNGKey(0)
    kx1, kx2, kp1, kp2, kp3 = jax.random.split(key, 5)

    # Case 1: projection shortcut (stride=2, 16 -> 32 ch), im2col + fused
    #         shortcut path, b=2 samples per grid step, grid length 2.
    n, in_planes, planes, hw, stride = 4, 16, 32, 16, 2
    x = jax.random.normal(kx1, (n, in_planes, hw, hw), jnp.float32)   # NCHW
    params = init_params(kp1, in_planes, planes, stride)
    y = jax.block_until_ready(basic_block_forward(x, params, stride))
    assert y.shape == (n, planes, hw // stride, hw // stride)
    np.testing.assert_allclose(np.asarray(y),
                               np.asarray(basic_block_ref(x, params, stride)),
                               rtol=1e-4, atol=1e-4)

    # Case 2: identity shortcut (stride=1, 16 -> 16), direct in-kernel conv1
    #         taps, b=2 samples per grid step (512 rows/step).
    params2 = init_params(kp2, in_planes, in_planes, 1)
    y2 = jax.block_until_ready(basic_block_forward(x, params2, 1))
    assert y2.shape == (n, in_planes, hw, hw)
    np.testing.assert_allclose(np.asarray(y2),
                               np.asarray(basic_block_ref(x, params2, 1)),
                               rtol=1e-4, atol=1e-4)

    # Case 3: stride=1 projection (16 -> 32 ch) exercises the direct path's
    #         1x1-projection branch.
    x3 = jax.random.normal(kx2, (2, in_planes, hw, hw), jnp.float32)
    params3 = init_params(kp3, in_planes, planes, 1)
    y3 = jax.block_until_ready(basic_block_forward(x3, params3, 1))
    assert y3.shape == (2, planes, hw, hw)
    np.testing.assert_allclose(np.asarray(y3),
                               np.asarray(basic_block_ref(x3, params3, 1)),
                               rtol=1e-4, atol=1e-4)

    print("KERNEL_OK")
</pallas_src>

<mosaic_0001>
module attributes {stable_mosaic.version = 11 : i64} {
  func.func @_bb_kernel_im2col(%arg0: i32, %arg1: memref<128x144xf32, #tpu.memory_space<vmem>>, %arg2: memref<144x64xf32, #tpu.memory_space<vmem>>, %arg3: memref<1x64xf32, #tpu.memory_space<vmem>>, %arg4: memref<1x64xf32, #tpu.memory_space<vmem>>, %arg5: memref<288x32xf32, #tpu.memory_space<vmem>>, %arg6: memref<1x32xf32, #tpu.memory_space<vmem>>, %arg7: memref<1x32xf32, #tpu.memory_space<vmem>>, %arg8: memref<128x32xf32, #tpu.memory_space<vmem>>, %arg9: memref<2x10x10x32xf32, #tpu.memory_space<vmem>>) attributes {dimension_semantics = [#tpu.dimension_semantics<parallel>], iteration_bounds = array<i64: 2>, scalar_prefetch = 0 : i64, scratch_operands = 1 : i64, tpu.core_type = #tpu.core_type<tc>, window_params = [{transform_indices = @transform_0, window_bounds = array<i64: 128, 144>}, {pipeline_mode = #tpu.pipeline_mode<synchronous>, transform_indices = @transform_1, window_bounds = array<i64: 144, 64>}, {pipeline_mode = #tpu.pipeline_mode<synchronous>, transform_indices = @transform_2, window_bounds = array<i64: 1, 64>}, {pipeline_mode = #tpu.pipeline_mode<synchronous>, transform_indices = @transform_3, window_bounds = array<i64: 1, 64>}, {pipeline_mode = #tpu.pipeline_mode<synchronous>, transform_indices = @transform_4, window_bounds = array<i64: 288, 32>}, {pipeline_mode = #tpu.pipeline_mode<synchronous>, transform_indices = @transform_5, window_bounds = array<i64: 1, 32>}, {pipeline_mode = #tpu.pipeline_mode<synchronous>, transform_indices = @transform_6, window_bounds = array<i64: 1, 32>}, {transform_indices = @transform_7, window_bounds = array<i64: 128, 32>}]} {
    %c0 = arith.constant 0 : index
    %c0_0 = arith.constant 0 : index
    %0 = vector.load %arg1[%c0, %c0_0] : memref<128x144xf32, #tpu.memory_space<vmem>>, vector<128x144xf32>
    %c0_1 = arith.constant 0 : index
    %c0_2 = arith.constant 0 : index
    %1 = vector.load %arg2[%c0_1, %c0_2] : memref<144x64xf32, #tpu.memory_space<vmem>>, vector<144x64xf32>
    %cst = arith.constant dense<0.000000e+00> : vector<128x64xf32>
    %2 = tpu.matmul %0, %1, %cst {dimension_numbers = #tpu.dot_dimension_numbers<[1], [0], [0], [1], [0, 0, 1, 1], [], []>} : vector<128x144xf32>, vector<144x64xf32>, vector<128x64xf32> -> vector<128x64xf32>
    %c0_3 = arith.constant 0 : index
    %c0_4 = arith.constant 0 : index
    %3 = vector.load %arg3[%c0_3, %c0_4] : memref<1x64xf32, #tpu.memory_space<vmem>>, vector<1x64xf32>
    %4 = vector.broadcast %3 : vector<1x64xf32> to vector<128x64xf32>
    %5 = arith.mulf %2, %4 : vector<128x64xf32>
    %c0_5 = arith.constant 0 : index
    %c0_6 = arith.constant 0 : index
    %6 = vector.load %arg4[%c0_5, %c0_6] : memref<1x64xf32, #tpu.memory_space<vmem>>, vector<1x64xf32>
    %7 = vector.broadcast %6 : vector<1x64xf32> to vector<128x64xf32>
    %8 = arith.addf %5, %7 : vector<128x64xf32>
    %9 = vector.extract_strided_slice %8 {offsets = [0, 0], sizes = [128, 32], strides = [1, 1]} : vector<128x64xf32> to vector<128x32xf32>
    %cst_7 = arith.constant 0.000000e+00 : f32
    %10 = vector.broadcast %cst_7 : f32 to vector<128x32xf32>
    %11 = arith.maximumf %9, %10 : vector<128x32xf32>
    %12 = vector.extract_strided_slice %8 {offsets = [0, 32], sizes = [128, 32], strides = [1, 1]} : vector<128x64xf32> to vector<128x32xf32>
    %cst_8 = arith.constant 0.000000e+00 : f32
    %13 = vector.broadcast %cst_8 : f32 to vector<2x1x10x32xf32>
    %cst_9 = arith.constant 0.000000e+00 : f32
    %14 = vector.broadcast %cst_9 : f32 to vector<2x10x1x32xf32>
    %c0_10 = arith.constant 0 : index
    %c0_11 = arith.constant 0 : index
    %c0_12 = arith.constant 0 : index
    %c0_13 = arith.constant 0 : index
    %15 = vector.load %arg9[%c0_10, %c0_11, %c0_12, %c0_13] : memref<2x10x10x32xf32, #tpu.memory_space<vmem>>, vector<2x1x10x32xf32>
    tpu.vector_store %arg9[%c0_10, %c0_11, %c0_12, %c0_13], %13 {strides = array<i32>} : memref<2x10x10x32xf32, #tpu.memory_space<vmem>>, vector<2x1x10x32xf32>,
    %c0_14 = arith.constant 0 : index
    %c9 = arith.constant 9 : index
    %c0_15 = arith.constant 0 : index
    %c0_16 = arith.constant 0 : index
    %16 = vector.load %arg9[%c0_14, %c9, %c0_15, %c0_16] : memref<2x10x10x32xf32, #tpu.memory_space<vmem>>, vector<2x1x10x32xf32>
    tpu.vector_store %arg9[%c0_14, %c9, %c0_15, %c0_16], %13 {strides = array<i32>} : memref<2x10x10x32xf32, #tpu.memory_space<vmem>>, vector<2x1x10x32xf32>,
    %c0_17 = arith.constant 0 : index
    %c0_18 = arith.constant 0 : index
    %c0_19 = arith.constant 0 : index
    %c0_20 = arith.constant 0 : index
    %17 = vector.load %arg9[%c0_17, %c0_18, %c0_19, %c0_20] : memref<2x10x10x32xf32, #tpu.memory_space<vmem>>, vector<2x10x1x32xf32>
    tpu.vector_store %arg9[%c0_17, %c0_18, %c0_19, %c0_20], %14 {strides = array<i32>} : memref<2x10x10x32xf32, #tpu.memory_space<vmem>>, vector<2x10x1x32xf32>,
    %c0_21 = arith.constant 0 : index
    %c0_22 = arith.constant 0 : index
    %c9_23 = arith.constant 9 : index
    %c0_24 = arith.constant 0 : index
    %18 = vector.load %arg9[%c0_21, %c0_22, %c9_23, %c0_24] : memref<2x10x10x32xf32, #tpu.memory_space<vmem>>, vector<2x10x1x32xf32>
    tpu.vector_store %arg9[%c0_21, %c0_22, %c9_23, %c0_24], %14 {strides = array<i32>} : memref<2x10x10x32xf32, #tpu.memory_space<vmem>>, vector<2x10x1x32xf32>,
    %19 = vector.shape_cast %11 : vector<128x32xf32> to vector<2x8x8x32xf32>
    %c0_25 = arith.constant 0 : index
    %c1 = arith.constant 1 : index
    %c1_26 = arith.constant 1 : index
    %c0_27 = arith.constant 0 : index
    %20 = vector.load %arg9[%c0_25, %c1, %c1_26, %c0_27] : memref<2x10x10x32xf32, #tpu.memory_space<vmem>>, vector<2x8x8x32xf32>
    tpu.vector_store %arg9[%c0_25, %c1, %c1_26, %c0_27], %19 {strides = array<i32>} : memref<2x10x10x32xf32, #tpu.memory_space<vmem>>, vector<2x8x8x32xf32>,
    %c0_28 = arith.constant 0 : index
    %c0_29 = arith.constant 0 : index
    %c0_30 = arith.constant 0 : index
    %c0_31 = arith.constant 0 : index
    %21 = vector.load %arg9[%c0_28, %c0_29, %c0_30, %c0_31] : memref<2x10x10x32xf32, #tpu.memory_space<vmem>>, vector<2x8x8x32xf32>
    %22 = vector.shape_cast %21 : vector<2x8x8x32xf32> to vector<128x32xf32>
    %c0_32 = arith.constant 0 : index
    %c0_33 = arith.constant 0 : index
    %23 = vector.load %arg5[%c0_32, %c0_33] : memref<288x32xf32, #tpu.memory_space<vmem>>, vector<32x32xf32>
    %cst_34 = arith.constant dense<0.000000e+00> : vector<128x32xf32>
    %24 = tpu.matmul %22, %23, %cst_34 {dimension_numbers = #tpu.dot_dimension_numbers<[1], [0], [0], [1], [0, 0, 1, 1], [], []>} : vector<128x32xf32>, vector<32x32xf32>, vector<128x32xf32> -> vector<128x32xf32>
    %c0_35 = arith.constant 0 : index
    %c0_36 = arith.constant 0 : index
    %c1_37 = arith.constant 1 : index
    %c0_38 = arith.constant 0 : index
    %25 = vector.load %arg9[%c0_35, %c0_36, %c1_37, %c0_38] : memref<2x10x10x32xf32, #tpu.memory_space<vmem>>, vector<2x8x8x32xf32>
    %26 = vector.shape_cast %25 : vector<2x8x8x32xf32> to vector<128x32xf32>
    %c32 = arith.constant 32 : index
    %c0_39 = arith.constant 0 : index
    %27 = vector.load %arg5[%c32, %c0_39] : memref<288x32xf32, #tpu.memory_space<vmem>>, vector<32x32xf32>
    %cst_40 = arith.constant dense<0.000000e+00> : vector<128x32xf32>
    %28 = tpu.matmul %26, %27, %cst_40 {dimension_numbers = #tpu.dot_dimension_numbers<[1], [0], [0], [1], [0, 0, 1, 1], [], []>} : vector<128x32xf32>, vector<32x32xf32>, vector<128x32xf32> -> vector<128x32xf32>
    %29 = arith.addf %24, %28 : vector<128x32xf32>
    %c0_41 = arith.constant 0 : index
    %c0_42 = arith.constant 0 : index
    %c2 = arith.constant 2 : index
    %c0_43 = arith.constant 0 : index
    %30 = vector.load %arg9[%c0_41, %c0_42, %c2, %c0_43] : memref<2x10x10x32xf32, #tpu.memory_space<vmem>>, vector<2x8x8x32xf32>
    %31 = vector.shape_cast %30 : vector<2x8x8x32xf32> to vector<128x32xf32>
    %c64 = arith.constant 64 : index
    %c0_44 = arith.constant 0 : index
    %32 = vector.load %arg5[%c64, %c0_44] : memref<288x32xf32, #tpu.memory_space<vmem>>, vector<32x32xf32>
    %cst_45 = arith.constant dense<0.000000e+00> : vector<128x32xf32>
    %33 = tpu.matmul %31, %32, %cst_45 {dimension_numbers = #tpu.dot_dimension_numbers<[1], [0], [0], [1], [0, 0, 1, 1], [], []>} : vector<128x32xf32>, vector<32x32xf32>, vector<128x32xf32> -> vector<128x32xf32>
    %34 = arith.addf %29, %33 : vector<128x32xf32>
    %c0_46 = arith.constant 0 : index
    %c1_47 = arith.constant 1 : index
    %c0_48 = arith.constant 0 : index
    %c0_49 = arith.constant 0 : index
    %35 = vector.load %arg9[%c0_46, %c1_47, %c0_48, %c0_49] : memref<2x10x10x32xf32, #tpu.memory_space<vmem>>, vector<2x8x8x32xf32>
    %36 = vector.shape_cast %35 : vector<2x8x8x32xf32> to vector<128x32xf32>
    %c96 = arith.constant 96 : index
    %c0_50 = arith.constant 0 : index
    %37 = vector.load %arg5[%c96, %c0_50] : memref<288x32xf32, #tpu.memory_space<vmem>>, vector<32x32xf32>
    %cst_51 = arith.constant dense<0.000000e+00> : vector<128x32xf32>
    %38 = tpu.matmul %36, %37, %cst_51 {dimension_numbers = #tpu.dot_dimension_numbers<[1], [0], [0], [1], [0, 0, 1, 1], [], []>} : vector<128x32xf32>, vector<32x32xf32>, vector<128x32xf32> -> vector<128x32xf32>
    %39 = arith.addf %34, %38 : vector<128x32xf32>
    %c0_52 = arith.constant 0 : index
    %c1_53 = arith.constant 1 : index
    %c1_54 = arith.constant 1 : index
    %c0_55 = arith.constant 0 : index
    %40 = vector.load %arg9[%c0_52, %c1_53, %c1_54, %c0_55] : memref<2x10x10x32xf32, #tpu.memory_space<vmem>>, vector<2x8x8x32xf32>
    %41 = vector.shape_cast %40 : vector<2x8x8x32xf32> to vector<128x32xf32>
    %c128 = arith.constant 128 : index
    %c0_56 = arith.constant 0 : index
    %42 = vector.load %arg5[%c128, %c0_56] : memref<288x32xf32, #tpu.memory_space<vmem>>, vector<32x32xf32>
    %cst_57 = arith.constant dense<0.000000e+00> : vector<128x32xf32>
    %43 = tpu.matmul %41, %42, %cst_57 {dimension_numbers = #tpu.dot_dimension_numbers<[1], [0], [0], [1], [0, 0, 1, 1], [], []>} : vector<128x32xf32>, vector<32x32xf32>, vector<128x32xf32> -> vector<128x32xf32>
    %44 = arith.addf %39, %43 : vector<128x32xf32>
    %c0_58 = arith.constant 0 : index
    %c1_59 = arith.constant 1 : index
    %c2_60 = arith.constant 2 : index
    %c0_61 = arith.constant 0 : index
    %45 = vector.load %arg9[%c0_58, %c1_59, %c2_60, %c0_61] : memref<2x10x10x32xf32, #tpu.memory_space<vmem>>, vector<2x8x8x32xf32>
    %46 = vector.shape_cast %45 : vector<2x8x8x32xf32> to vector<128x32xf32>
    %c160 = arith.constant 160 : index
    %c0_62 = arith.constant 0 : index
    %47 = vector.load %arg5[%c160, %c0_62] : memref<288x32xf32, #tpu.memory_space<vmem>>, vector<32x32xf32>
    %cst_63 = arith.constant dense<0.000000e+00> : vector<128x32xf32>
    %48 = tpu.matmul %46, %47, %cst_63 {dimension_numbers = #tpu.dot_dimension_numbers<[1], [0], [0], [1], [0, 0, 1, 1], [], []>} : vector<128x32xf32>, vector<32x32xf32>, vector<128x32xf32> -> vector<128x32xf32>
    %49 = arith.addf %44, %48 : vector<128x32xf32>
    %c0_64 = arith.constant 0 : index
    %c2_65 = arith.constant 2 : index
    %c0_66 = arith.constant 0 : index
    %c0_67 = arith.constant 0 : index
    %50 = vector.load %arg9[%c0_64, %c2_65, %c0_66, %c0_67] : memref<2x10x10x32xf32, #tpu.memory_space<vmem>>, vector<2x8x8x32xf32>
    %51 = vector.shape_cast %50 : vector<2x8x8x32xf32> to vector<128x32xf32>
    %c192 = arith.constant 192 : index
    %c0_68 = arith.constant 0 : index
    %52 = vector.load %arg5[%c192, %c0_68] : memref<288x32xf32, #tpu.memory_space<vmem>>, vector<32x32xf32>
    %cst_69 = arith.constant dense<0.000000e+00> : vector<128x32xf32>
    %53 = tpu.matmul %51, %52, %cst_69 {dimension_numbers = #tpu.dot_dimension_numbers<[1], [0], [0], [1], [0, 0, 1, 1], [], []>} : vector<128x32xf32>, vector<32x32xf32>, vector<128x32xf32> -> vector<128x32xf32>
    %54 = arith.addf %49, %53 : vector<128x32xf32>
    %c0_70 = arith.constant 0 : index
    %c2_71 = arith.constant 2 : index
    %c1_72 = arith.constant 1 : index
    %c0_73 = arith.constant 0 : index
    %55 = vector.load %arg9[%c0_70, %c2_71, %c1_72, %c0_73] : memref<2x10x10x32xf32, #tpu.memory_space<vmem>>, vector<2x8x8x32xf32>
    %56 = vector.shape_cast %55 : vector<2x8x8x32xf32> to vector<128x32xf32>
    %c224 = arith.constant 224 : index
    %c0_74 = arith.constant 0 : index
    %57 = vector.load %arg5[%c224, %c0_74] : memref<288x32xf32, #tpu.memory_space<vmem>>, vector<32x32xf32>
    %cst_75 = arith.constant dense<0.000000e+00> : vector<128x32xf32>
    %58 = tpu.matmul %56, %57, %cst_75 {dimension_numbers = #tpu.dot_dimension_numbers<[1], [0], [0], [1], [0, 0, 1, 1], [], []>} : vector<128x32xf32>, vector<32x32xf32>, vector<128x32xf32> -> vector<128x32xf32>
    %59 = arith.addf %54, %58 : vector<128x32xf32>
    %c0_76 = arith.constant 0 : index
    %c2_77 = arith.constant 2 : index
    %c2_78 = arith.constant 2 : index
    %c0_79 = arith.constant 0 : index
    %60 = vector.load %arg9[%c0_76, %c2_77, %c2_78, %c0_79] : memref<2x10x10x32xf32, #tpu.memory_space<vmem>>, vector<2x8x8x32xf32>
    %61 = vector.shape_cast %60 : vector<2x8x8x32xf32> to vector<128x32xf32>
    %c256 = arith.constant 256 : index
    %c0_80 = arith.constant 0 : index
    %62 = vector.load %arg5[%c256, %c0_80] : memref<288x32xf32, #tpu.memory_space<vmem>>, vector<32x32xf32>
    %cst_81 = arith.constant dense<0.000000e+00> : vector<128x32xf32>
    %63 = tpu.matmul %61, %62, %cst_81 {dimension_numbers = #tpu.dot_dimension_numbers<[1], [0], [0], [1], [0, 0, 1, 1], [], []>} : vector<128x32xf32>, vector<32x32xf32>, vector<128x32xf32> -> vector<128x32xf32>
    %64 = arith.addf %59, %63 : vector<128x32xf32>
    %c0_82 = arith.constant 0 : index
    %c0_83 = arith.constant 0 : index
    %65 = vector.load %arg6[%c0_82, %c0_83] : memref<1x32xf32, #tpu.memory_space<vmem>>, vector<1x32xf32>
    %66 = vector.broadcast %65 : vector<1x32xf32> to vector<128x32xf32>
    %67 = arith.mulf %64, %66 : vector<128x32xf32>
    %c0_84 = arith.constant 0 : index
    %c0_85 = arith.constant 0 : index
    %68 = vector.load %arg7[%c0_84, %c0_85] : memref<1x32xf32, #tpu.memory_space<vmem>>, vector<1x32xf32>
    %69 = vector.broadcast %68 : vector<1x32xf32> to vector<128x32xf32>
    %70 = arith.addf %67, %69 : vector<128x32xf32>
    %cst_86 = arith.constant 0.000000e+00 : f32
    %71 = vector.broadcast %cst_86 : f32 to vector<128x32xf32>
    %72 = arith.maximumf %70, %71 : vector<128x32xf32>
    %73 = arith.addf %72, %12 : vector<128x32xf32>
    %cst_87 = arith.constant 0.000000e+00 : f32
    %74 = vector.broadcast %cst_87 : f32 to vector<128x32xf32>
    %75 = arith.maximumf %73, %74 : vector<128x32xf32>
    %c0_88 = arith.constant 0 : index
    %c0_89 = arith.constant 0 : index
    %76 = vector.load %arg8[%c0_88, %c0_89] : memref<128x32xf32, #tpu.memory_space<vmem>>, vector<128x32xf32>
    tpu.vector_store %arg8[%c0_88, %c0_89], %75 {strides = array<i32>} : memref<128x32xf32, #tpu.memory_space<vmem>>, vector<128x32xf32>,
    return
  }
  func.func @transform_0(%arg0: i32) -> (i32, i32) {
    %c0_i32 = arith.constant 0 : i32
    %c0_i32_0 = arith.constant 0 : i32
    return %arg0, %c0_i32 : i32, i32
  }
  func.func @transform_1(%arg0: i32) -> (i32, i32) {
    %c0_i32 = arith.constant 0 : i32
    %c0_i32_0 = arith.constant 0 : i32
    %c0_i32_1 = arith.constant 0 : i32
    return %c0_i32, %c0_i32_0 : i32, i32
  }
  func.func @transform_2(%arg0: i32) -> (i32, i32) {
    %c0_i32 = arith.constant 0 : i32
    %c0_i32_0 = arith.constant 0 : i32
    %c0_i32_1 = arith.constant 0 : i32
    return %c0_i32, %c0_i32_0 : i32, i32
  }
  func.func @transform_3(%arg0: i32) -> (i32, i32) {
    %c0_i32 = arith.constant 0 : i32
    %c0_i32_0 = arith.constant 0 : i32
    %c0_i32_1 = arith.constant 0 : i32
    return %c0_i32, %c0_i32_0 : i32, i32
  }
  func.func @transform_4(%arg0: i32) -> (i32, i32) {
    %c0_i32 = arith.constant 0 : i32
    %c0_i32_0 = arith.constant 0 : i32
    %c0_i32_1 = arith.constant 0 : i32
    return %c0_i32, %c0_i32_0 : i32, i32
  }
  func.func @transform_5(%arg0: i32) -> (i32, i32) {
    %c0_i32 = arith.constant 0 : i32
    %c0_i32_0 = arith.constant 0 : i32
    %c0_i32_1 = arith.constant 0 : i32
    return %c0_i32, %c0_i32_0 : i32, i32
  }
  func.func @transform_6(%arg0: i32) -> (i32, i32) {
    %c0_i32 = arith.constant 0 : i32
    %c0_i32_0 = arith.constant 0 : i32
    %c0_i32_1 = arith.constant 0 : i32
    return %c0_i32, %c0_i32_0 : i32, i32
  }
  func.func @transform_7(%arg0: i32) -> (i32, i32) {
    %c0_i32 = arith.constant 0 : i32
    %c0_i32_0 = arith.constant 0 : i32
    return %arg0, %c0_i32 : i32, i32
  }
}

</mosaic_0001>

<bundles_post_ra>
// kernel: basic_block_forward.1
= control target key start
LH: loop header
LB: loop body
LE: loop exit
PB: predicated region body
PF: predicated region fallthrough
CT: control target
= control target key end

     0   :  { %12 = vsyncpa [#allocation4], 0  ;;  %s3583_s0 = inlined_call_operand.vmem [shape: f32[256,144], index: 0, kind: input, shape index: {}]   ;;  %s3584_s1 = inlined_call_operand.vmem [shape: f32[144,64], index: 1, kind: input, shape index: {}]   ;;  %s3585_s2 = inlined_call_operand.vmem [shape: f32[1,64], index: 2, kind: input, shape index: {}]   ;;  %s3586_s3 = inlined_call_operand.vmem [shape: f32[1,64], index: 3, kind: input, shape index: {}]   ;;  %s3587_s4 = inlined_call_operand.vmem [shape: f32[288,32], index: 4, kind: input, shape index: {}]   ;;  %s3588_s5 = inlined_call_operand.vmem [shape: f32[1,32], index: 5, kind: input, shape index: {}]   ;;  %s3589_s6 = inlined_call_operand.vmem [shape: f32[1,32], index: 6, kind: input, shape index: {}]   ;;  %s3590_s7 = inlined_call_operand.hbm [shape: f32[256,32], index: 7, kind: output, shape index: {}]  }
   0x1   :  { %14 = vsyncpa [#allocation4 + $0x1], 0  ;;  %s2533_s24 = smov 0   ;;  %s2535_s25 = smov 0  }
   0x2   :  { %s2537_s26 = smov 0   ;;  %s2539_s27 = smov 0  }
   0x3 LB: > { %s2554_s28 = sadd.s32 4294967295, %s2487_s27   ;;  %s2193_s29 = sadd.s32 4294967294, %s2487_s27   ;;  %s2487_s27 = sphi %s2539_s27, %s3633_s27   ;;  %s2483_s26 = sphi %s2537_s26, %s3632_s26   ;;  %s2479_s25 = sphi %s2535_s25, %s3631_s25   ;;  %s2475_s24 = sphi %s2533_s24, %s3630_s24  }
   0x4   : > { %s2558_s30 = sadd.s32 1, %s2487_s27   ;;  %s179_s8 = sadd.s32 1, %s2483_s26 }
   0x5   : > { %s176_s9 = ssub.s32 %s2487_s27, %s2558_s30  ;;  %p189_p0 = scmp.ne.s32.totalorder %s2483_s26, %s2479_s25 }
   0x6   : > { %p177_p1 = scmp.eq.s32.totalorder %s176_s9, 0  ;;  %p190_p2 = scmp.eq.s32.totalorder %s2554_s28, 1 }
   0x7   : > { %p195_p3 = scmp.ne.s32.totalorder %s2479_s25, %s2475_s24  ;;  %p196_p4 = scmp.eq.s32.totalorder %s2193_s29, 1 }
   0x8   : > { %s2569_s10 = scalar_select %p177_p1, %s2483_s26, %s179_s8  }
   0x9   : > { %p2571_p5 = por %p190_p2, %p189_p0  ;;  %p2575_p6 = por %p196_p4, %p195_p3 }
   0xa   : > { %p2196_p7 = scmp.ge.s32.totalorder %s2487_s27, 1  ;;  %p242_p8 = scmp.lt.s32.totalorder %s2487_s27, 3 }
   0xc   : > { %p243_p9 = pnand %p2196_p7, %p242_p8 }
   0xe   : > { %246 = sbr.rel (%p243_p9) target bundleno = 721 (0x2d1), region = 48 }
  0x13   : > { %v330_v0 = vld [vmem:[%s3584_s1 + $0x78] sm:$0xff]  ;;  %v329_v1 = vld [vmem:[%s3584_s1 + $0x70] sm:$0xff]  ;;  %s2198_s17 = sshll.u32 %s2554_s28, 4  ;;  %v328_v2 = vld [vmem:[%s3584_s1 + $0x68] sm:$0xff]  ;;  %vm333_vm0 = vcmask 130048   ;;  %vm579_vm1 = vcmask 253952  }
  0x14   : > { %382 = vmatpush.msra.mxu0 %v330_v0  ;;  %p276_p10 = scmp.lt.s32.totalorder %s2198_s17, 31  ;;  %v327_v3 = vld [vmem:[%s3584_s1 + $0x60] sm:$0xff]  ;;  %v326_v4 = vld [vmem:[%s3584_s1 + $0x58] sm:$0xff]  ;;  %v332_v5 = vld [vmem:[%s3584_s1 + $0x88] sm:$0xff]  ;;  %vm568_vm2 = vcmask 261120   ;;  %v2489_v51 = vmov 0.0  }
  0x15   : > { %2368 = vmatpush.msra.mxu1 %v332_v5  ;;  %v325_v6 = vld [vmem:[%s3584_s1 + $0x50] sm:$0xff]  ;;  %v331_v7 = vld [vmem:[%s3584_s1 + $0x80] sm:$0xff]  ;;  %v324_v8 = vld [vmem:[%s3584_s1 + $0x48] sm:$0xff]  ;;  %583 = vst.msk [vmem:[#allocation2 + $0x30] sm:$0x1] %vm579_vm1, %v2489_v51  ;;  %vm570_vm3 = vcmask 254976  }
  0x16   : > { %383 = vmatpush.msra.mxu0 %v329_v1  ;;  %s3635_s17 = smov (!%p276_p10, %s2198_s17), 31  ;;  %v323_v9 = vld [vmem:[%s3584_s1 + $0x40] sm:$0xff]  ;;  %v322_v10 = vld [vmem:[%s3584_s1 + $0x38] sm:$0xff]  ;;  %v321_v12 = vld [vmem:[%s3584_s1 + $0x30] sm:$0xff]  ;;  %569 = vst.msk [vmem:[#allocation2] sm:$0xff] %vm568_vm2, %v2489_v51  ;;  %s272_s13 = sand.u32 1, %s2479_s25  }
  0x17   : > { %2369 = vmatpush.msra.mxu1 %v331_v7  ;;  %s2366_s19 = sshll.u32 %s3635_s17, 4  ;;  %v320_v13 = vld [vmem:[%s3584_s1 + $0x28] sm:$0xff]  ;;  %v319_v14 = vld [vmem:[%s3584_s1 + $0x20] sm:$0xff]  ;;  %v318_v15 = vld [vmem:[%s3584_s1 + $0x18] sm:$0xff]  ;;  %572 = vst.msk [vmem:[#allocation2 + $0xa0] sm:$0xff] %vm568_vm2, %v2489_v51  ;;  %s2490_s17 = smov 96  }
  0x18   : > { %384 = vmatpush.msra.mxu0 %v328_v2  ;;  %s2618_s9 = scalar_lea.vmem %s3583_s0, %s2366_s19  ;;  %v317_v17 = vld [vmem:[%s3584_s1 + $0x10] sm:$0xff]  ;;  %v316_v18 = vld [vmem:[%s3584_s1 + $0x8] sm:$0xff]  ;;  %v315_v19 = vld [vmem:[%s3584_s1] sm:$0xff]  ;;  %575 = vst.msk [vmem:[#allocation2 + $0x90] sm:$0xff] %vm568_vm2, %v2489_v51  ;;  %s2197_s14 = sshll.u32 %s272_s13, 7 }
  0x19   : > { %v288_v11 = vld [vmem:[%s2618_s9 + $0x28] sm:$0xff]  ;;  %v290_v16 = vld [vmem:[%s2618_s9 + $0x38] sm:$0xff]  ;;  %v283_v20 = vld [vmem:[%s2618_s9] sm:$0xff]  ;;  %577 = vst.msk [vmem:[#allocation2 + $0x130] sm:$0xff] %vm568_vm2, %v2489_v51  ;;  %s3470_s15 = scalar_lea.vmem [#allocation3], %s2197_s14  ;;  %s2367_s16 = sshll.u32 %s2554_s28, 7 }
  0x1a   : > { %385 = vmatpush.msra.mxu0 %v327_v3  ;;  %2203 = vmatmul.msk.f32.vlgmr.msra.gmra.mxu1 %vm333_vm0, %v288_v11  ;;  %v292_v21 = vld [vmem:[%s2618_s9 + $0x48] sm:$0xff]  ;;  %v285_v22 = vld [vmem:[%s2618_s9 + $0x10] sm:$0xff]  ;;  %v294_v23 = vld [vmem:[%s2618_s9 + $0x58] sm:$0xff]  ;;  %581 = vst.msk [vmem:[#allocation2 + $0x10] sm:$0x1] %vm579_vm1, %v2489_v51  ;;  %s2127_s20 = scalar_lea.hbm %s3590_s7, %s2367_s16  ;;  %s2116_s28 = scalar_lea.sflag [#allocation4], %s272_s13 }
  0x1b   : > { %v287_v24 = vld [vmem:[%s2618_s9 + $0x20] sm:$0xff]  ;;  %v296_v25 = vld [vmem:[%s2618_s9 + $0x68] sm:$0xff]  ;;  %v289_v26 = vld [vmem:[%s2618_s9 + $0x30] sm:$0xff]  ;;  %582 = vst.msk [vmem:[#allocation2 + $0x20] sm:$0x1] %vm579_vm1, %v2489_v51  ;;  %s2130_s21 = sshll.u32 %s2127_s20, 4  ;;  %s2131_s21 = int_to_ptr.hbm [resolvable:$true] %s2130_s21 }
  0x1c   : > { %386 = vmatpush.msra.mxu0 %v326_v4  ;;  %v298_v27 = vld [vmem:[%s2618_s9 + $0x78] sm:$0xff]  ;;  %v291_v28 = vld [vmem:[%s2618_s9 + $0x40] sm:$0xff]  ;;  %v300_v29 = vld [vmem:[%s2618_s9 + $0x88] sm:$0xff]  ;;  %584 = vst.msk [vmem:[#allocation2 + $0x40] sm:$0x1] %vm579_vm1, %v2489_v51  ;;  %s2439_s22 = sshra.s32 %s2131_s21, 4  ;;  %s2440_s22 = int_to_ptr.hbm [resolvable:$true] %s2439_s22 }
  0x1d   : > { %v293_v30 = vld [vmem:[%s2618_s9 + $0x50] sm:$0xff]  ;;  %v302_v31 = vld [vmem:[%s2618_s9 + $0x98] sm:$0xff]  ;;  %v295_v32 = vld [vmem:[%s2618_s9 + $0x60] sm:$0xff]  ;;  %585 = vst.msk [vmem:[#allocation2 + $0x50] sm:$0x1] %vm579_vm1, %v2489_v51  ;;  %s2441_s23 = scalar_lea.hbm %s2440_s22, 128  ;;  %p2446_p0 = scmp.lt.s32.totalorder %s2440_s22, %s3590_s7 }
  0x1e   : > { %387 = vmatpush.msra.mxu0 %v325_v6  ;;  %v304_v33 = vld [vmem:[%s2618_s9 + $0xa8] sm:$0xff]  ;;  %v297_v34 = vld [vmem:[%s2618_s9 + $0x70] sm:$0xff]  ;;  %v306_v35 = vld [vmem:[%s2618_s9 + $0xb8] sm:$0xff]  ;;  %586 = vst.msk [vmem:[#allocation2 + $0x60] sm:$0x1] %vm579_vm1, %v2489_v51  ;;  %p2442_p11 = scmp.ne.s32.totalorder %s2440_s22, %s2441_s23  ;;  %s2445_s8 = scalar_lea.hbm %s3590_s7, 256 }
  0x1f   : > { %v299_v36 = vld [vmem:[%s2618_s9 + $0x80] sm:$0xff]  ;;  %v308_v37 = vld [vmem:[%s2618_s9 + $0xc8] sm:$0xff]  ;;  %v301_v38 = vld [vmem:[%s2618_s9 + $0x90] sm:$0xff]  ;;  %587 = vst.msk [vmem:[#allocation2 + $0x70] sm:$0x1] %vm579_vm1, %v2489_v51  ;;  %p2447_p1 = scmp.lt.s32.totalorder %s2445_s8, %s2441_s23 }
  0x20   : > { %388 = vmatpush.msra.mxu0 %v324_v8  ;;  %v310_v39 = vld [vmem:[%s2618_s9 + $0xd8] sm:$0xff]  ;;  %v303_v40 = vld [vmem:[%s2618_s9 + $0xa0] sm:$0xff]  ;;  %v312_v41 = vld [vmem:[%s2618_s9 + $0xe8] sm:$0xff]  ;;  %588 = vst.msk [vmem:[#allocation2 + $0x80] sm:$0x1] %vm579_vm1, %v2489_v51  ;;  %p2443_p12 = pnand %p2442_p11, %p2571_p5 }
  0x21   : > { %v305_v42 = vld [vmem:[%s2618_s9 + $0xb0] sm:$0xff]  ;;  %v314_v43 = vld [vmem:[%s2618_s9 + $0xf8] sm:$0xff]  ;;  %v307_v44 = vld [vmem:[%s2618_s9 + $0xc0] sm:$0xff]  ;;  %591 = vst.msk [vmem:[#allocation2 + $0xb0] sm:$0x1] %vm579_vm1, %v2489_v51  ;;  %p2448_p2 = por %p2447_p1, %p2446_p0 }
  0x22   : > { %389 = vmatpush.msra.mxu0 %v323_v9  ;;  %2204 = vmatmul.msk.f32.gmra.mxu1 %vm333_vm0, %v290_v16  ;;  %v309_v45 = vld [vmem:[%s2618_s9 + $0xd0] sm:$0xff]  ;;  %v311_v46 = vld [vmem:[%s2618_s9 + $0xe0] sm:$0xff]  ;;  %v676_v49 = vld [vmem:[%s3587_s4 + $0x38] sm:$0xff]  ;;  %592 = vst.msk [vmem:[#allocation2 + $0xc0] sm:$0x1] %vm579_vm1, %v2489_v51  ;;  %p2444_p13 = pneg %p2443_p12 }
  0x23   : > { %v313_v48 = vld [vmem:[%s2618_s9 + $0xf0] sm:$0xff]  ;;  %v656_v50 = vld [vmem:[%s3587_s4 + $0x18] sm:$0xff]  ;;  %2370 = vmatpush.msra.mxu2 %v676_v49  ;;  %v674_v54 = vld [vmem:[%s3587_s4 + $0x28] sm:$0xff]  ;;  %593 = vst.msk [vmem:[#allocation2 + $0xd0] sm:$0x1] %vm579_vm1, %v2489_v51 }
  0x24   : > { %390 = vmatpush.msra.mxu0 %v322_v10  ;;  %2374 = vmatpush.msra.mxu3 %v656_v50  ;;  %v675_v52 = vld [vmem:[%s3587_s4 + $0x30] sm:$0xff]  ;;  %v654_v55 = vld [vmem:[%s3587_s4 + $0x8] sm:$0xff]  ;;  %v673_v57 = vld [vmem:[%s3587_s4 + $0x20] sm:$0xff]  ;;  %594 = vst.msk [vmem:[#allocation2 + $0xe0] sm:$0x1] %vm579_vm1, %v2489_v51  ;;  %p2449_p3 = pnand %p2448_p2, %p2444_p13 }
  0x25   : > { %v655_v53 = vld [vmem:[%s3587_s4 + $0x10] sm:$0xff]  ;;  %2371 = vmatpush.msra.mxu2 %v675_v52  ;;  %v653_v58 = vld [vmem:[%s3587_s4] sm:$0xff]  ;;  %v284_v60 = vld [vmem:[%s2618_s9 + $0x8] sm:$0xff]  ;;  %595 = vst.msk [vmem:[#allocation2 + $0xf0] sm:$0x1] %vm579_vm1, %v2489_v51 }
  0x26   : > { %391 = vmatpush.msra.mxu0 %v321_v12  ;;  %2375 = vmatpush.msra.mxu3 %v655_v53  ;;  %v922_v61 = vld [vmem:[%s3587_s4 + $0x58] sm:$0xff]  ;;  %596 = vst.msk [vmem:[#allocation2 + $0x100] sm:$0x1] %vm579_vm1, %v2489_v51  ;;  %v2777_v3 = vld [vmem:[%s3585_s2] ss:$0 sm:$0xff] }
  0x27   : > { %2372 = vmatpush.msra.mxu2 %v674_v54  ;;  %983 = vmatpush.msrb.mxu1 %v922_v61  ;;  %v286_v63 = vld [vmem:[%s2618_s9 + $0x18] sm:$0xff]  ;;  %597 = vst.msk [vmem:[#allocation2 + $0x110] sm:$0x1] %vm579_vm1, %v2489_v51  ;;  %v2787_v6 = vld [vmem:[%s3586_s3] ss:$0 sm:$0xff]  ;;  %s2128_s9 = sshll.u32 %s3470_s15, 4  ;;  %s2129_s9 = int_to_ptr.vmem [resolvable:$true] %s2128_s9 }
  0x28   : > { %392 = vmatpush.msra.mxu0 %v320_v13  ;;  %2376 = vmatpush.msra.mxu3 %v654_v55  ;;  %v1071_v1 = vld [vmem:[%s3587_s4 + $0x78] sm:$0xff]  ;;  %598 = vst.msk [vmem:[#allocation2 + $0x120] sm:$0x1] %vm579_vm1, %v2489_v51 }
  0x29   : > { %2373 = vmatpush.msra.mxu2 %v673_v57  ;;  %v1220_v2 = vld [vmem:[%s3587_s4 + $0x98] sm:$0xff]  ;;  %601 = vst.msk [vmem:[#allocation2 + $0x19] sm:$0x1] %vm579_vm1, %v2489_v51 }
  0x2a   : > { %393 = vmatpush.msra.mxu0 %v319_v14  ;;  %2205 = vmatmul.msk.f32.gmra.mxu1 %vm333_vm0, %v292_v21  ;;  %602 = vst.msk [vmem:[#allocation2 + $0x29] sm:$0x1] %vm579_vm1, %v2489_v51 }
  0x2b   : > { %2377 = vmatpush.msra.mxu3 %v653_v58  ;;  %1132 = vmatpush.msrb.mxu2 %v1071_v1  ;;  %603 = vst.msk [vmem:[#allocation2 + $0x39] sm:$0x1] %vm579_vm1, %v2489_v51 }
  0x2c   : > { %394 = vmatpush.msra.mxu0 %v318_v15  ;;  %604 = vst.msk [vmem:[#allocation2 + $0x49] sm:$0x1] %vm579_vm1, %v2489_v51 }
  0x2d   : > { %1281 = vmatpush.msrb.mxu3 %v1220_v2  ;;  %605 = vst.msk [vmem:[#allocation2 + $0x59] sm:$0x1] %vm579_vm1, %v2489_v51 }
  0x2e   : > { %395 = vmatpush.msra.mxu0 %v317_v17  ;;  %606 = vst.msk [vmem:[#allocation2 + $0x69] sm:$0x1] %vm579_vm1, %v2489_v51 }
  0x2f   : > { %607 = vst.msk [vmem:[#allocation2 + $0x79] sm:$0x1] %vm579_vm1, %v2489_v51 }
  0x30   : > { %396 = vmatpush.msra.mxu0 %v316_v18  ;;  %608 = vst.msk [vmem:[#allocation2 + $0x89] sm:$0x1] %vm579_vm1, %v2489_v51 }
  0x31   : > { %611 = vst.msk [vmem:[#allocation2 + $0xb9] sm:$0x1] %vm579_vm1, %v2489_v51 }
  0x32   : > { %397 = vmatpush.msra.mxu0 %v315_v19  ;;  %2206 = vmatmul.msk.f32.gmra.mxu1 %vm333_vm0, %v294_v23  ;;  %612 = vst.msk [vmem:[#allocation2 + $0xc9] sm:$0x1] %vm579_vm1, %v2489_v51  ;;  %v1070_v23 = vld [vmem:[%s3587_s4 + $0x70] sm:$0xff] }
  0x33   : > { %398 = vmatmul.f32.vlgmr.msra.gmra.mxu0 %v283_v20  ;;  %613 = vst.msk [vmem:[#allocation2 + $0xd9] sm:$0x1] %vm579_vm1, %v2489_v51  ;;  %1133 = vmatpush.msrb.mxu2 %v1070_v23 }
  0x34   : > { %461 = vmatpush.msrb.mxu0 %v332_v5  ;;  %614 = vst.msk [vmem:[#allocation2 + $0xe9] sm:$0x1] %vm579_vm1, %v2489_v51 }
  0x35   : > { %615 = vst.msk [vmem:[#allocation2 + $0xf9] sm:$0x1] %vm579_vm1, %v2489_v51 }
  0x36   : > { %462 = vmatpush.msrb.mxu0 %v331_v7  ;;  %616 = vst.msk [vmem:[#allocation2 + $0x109] sm:$0x1] %vm579_vm1, %v2489_v51 }
  0x37   : > { %617 = vst.msk [vmem:[#allocation2 + $0x119] sm:$0x1] %vm579_vm1, %v2489_v51 }
  0x38   : > { %737 = vmatpush.msra.mxu0 %v676_v49  ;;  %618 = vst.msk [vmem:[#allocation2 + $0x129] sm:$0x1] %vm579_vm1, %v2489_v51  ;;  %v920_v49 = vld [vmem:[%s3587_s4 + $0x48] sm:$0xff] }
  0x39   : > { %580 = vst.msk [vmem:[#allocation2] sm:$0x1] %vm579_vm1, %v2489_v51 }
  0x3a   : > { %2207 = vmatmul.msk.f32.gmra.mxu1 %vm333_vm0, %v296_v25  ;;  %738 = vmatpush.msra.mxu0 %v675_v52  ;;  %589 = vst.msk [vmem:[#allocation2 + $0x90] sm:$0x1] %vm579_vm1, %v2489_v51 }
  0x3b   : > { %401 = vmatmul.f32.gmra.mxu0 %v285_v22  ;;  %590 = vst.msk [vmem:[#allocation2 + $0xa0] sm:$0x1] %vm579_vm1, %v2489_v51  ;;  %v921_v22 = vld [vmem:[%s3587_s4 + $0x50] sm:$0xff] }
  0x3c   : > { %739 = vmatpush.msra.mxu0 %v674_v54  ;;  %599 = vst.msk [vmem:[#allocation2 + $0x130] sm:$0x1] %vm579_vm1, %v2489_v51  ;;  %984 = vmatpush.msrb.mxu1 %v921_v22 }
  0x3d   : > { %573 = vst.msk [vmem:[#allocation2 + $0xa8] sm:$0x3] %vm570_vm3, %v2489_v51 }
  0x3e   : > { %740 = vmatpush.msra.mxu0 %v673_v57  ;;  %571 = vst.msk [vmem:[#allocation2 + $0x8] sm:$0x3] %vm570_vm3, %v2489_v51  ;;  %985 = vmatpush.msrb.mxu1 %v920_v49 }
  0x3f   : > { %576 = vst.msk [vmem:[#allocation2 + $0x98] sm:$0x3] %vm570_vm3, %v2489_v51 }
  0x40   : > { %578 = vst.msk [vmem:[#allocation2 + $0x138] sm:$0x3] %vm570_vm3, %v2489_v51 }
  0x41   : > { %610 = vst.msk [vmem:[#allocation2 + $0xa9] sm:$0x1] %vm579_vm1, %v2489_v51 }
  0x42   : > { %2208 = vmatmul.msk.f32.gmra.mxu1 %vm333_vm0, %v298_v27  ;;  %600 = vst.msk [vmem:[#allocation2 + $0x9] sm:$0x1] %vm579_vm1, %v2489_v51 }
  0x43   : > { %404 = vmatmul.f32.gmra.mxu0 %v287_v24  ;;  %v1219_v24 = vld [vmem:[%s3587_s4 + $0x90] sm:$0xff]  ;;  %609 = vst.msk [vmem:[#allocation2 + $0x99] sm:$0x1] %vm579_vm1, %v2489_v51 }
  0x44   : > { %1282 = vmatpush.msrb.mxu3 %v1219_v24  ;;  %619 = vst.msk [vmem:[#allocation2 + $0x139] sm:$0x1] %vm579_vm1, %v2489_v51  ;;  %v1218_v51 = vld [vmem:[%s3587_s4 + $0x88] sm:$0xff] }
  0x46   : > { %1283 = vmatpush.msrb.mxu3 %v1218_v51 }
  0x49   : > { %v903_v49 = vld [vmem:[#allocation2 + $0x2] sm:$0xff] }
  0x4a   : > { %2209 = vmatmul.msk.f32.gmra.mxu1 %vm333_vm0, %v300_v29 }
  0x4b   : > { %407 = vmatmul.f32.gmra.mxu0 %v289_v26 }
  0x52   : > { %2210 = vmatmul.msk.f32.gmra.mxu1 %vm333_vm0, %v302_v31 }
  0x53   : > { %410 = vmatmul.f32.gmra.mxu0 %v291_v28 }
  0x5a   : > { %2211 = vmatmul.msk.f32.gmra.mxu1 %vm333_vm0, %v304_v33 }
  0x5b   : > { %413 = vmatmul.f32.gmra.mxu0 %v293_v30 }
  0x62   : > { %2212 = vmatmul.msk.f32.gmra.mxu1 %vm333_vm0, %v306_v35 }
  0x63   : > { %416 = vmatmul.f32.gmra.mxu0 %v295_v32 }
  0x6a   : > { %2213 = vmatmul.msk.f32.gmra.mxu1 %vm333_vm0, %v308_v37 }
  0x6b   : > { %419 = vmatmul.f32.gmra.mxu0 %v297_v34 }
  0x72   : > { %2214 = vmatmul.msk.f32.gmra.mxu1 %vm333_vm0, %v310_v39 }
  0x73   : > { %422 = vmatmul.f32.gmra.mxu0 %v299_v36 }
  0x7a   : > { %2215 = vmatmul.msk.f32.gmra.mxu1 %vm333_vm0, %v312_v41 }
  0x7b   : > { %425 = vmatmul.f32.gmra.mxu0 %v301_v38 }
  0x82   : > { %2216 = vmatmul.msk.f32.gmra.mxu1 %vm333_vm0, %v314_v43 }
  0x83   : > { %428 = vmatmul.f32.gmra.mxu0 %v303_v40 }
  0x8b   : > { %431 = vmatmul.f32.gmra.mxu0 %v305_v42 }
  0x93   : > { %434 = vmatmul.f32.gmra.mxu0 %v307_v44 }
  0x97   : > { %v2684_v47 = vpop.f32.mrf.mxu1 }
  0x9b   : > { %437 = vmatmul.f32.gmra.mxu0 %v309_v45 }
  0x9f   : > { %v2715_v56 = vpop.f32.mrf.mxu1 }
  0xa3   : > { %440 = vmatmul.f32.gmra.mxu0 %v311_v46 }
  0xa7   : > { %v476_v0 = vpop.f32.mrf.mxu1 }
  0xab   : > { %443 = vmatmul.f32.gmra.mxu0 %v313_v48 }
  0xaf   : > { %v479_v7 = vpop.f32.mrf.mxu1 }
  0xb0   : > { %v2727_v59 = vpop.f32.mrf.mxu0 }
  0xb3   : > { %2201 = vmatmul.msk.f32.vlgmr.msrb.gmra.mxu0 %vm333_vm0, %v284_v60 }
  0xb4   : > { %850 = vmatpush.msrb.mxu0 %v656_v50  ;;  %v1069_v50 = vld [vmem:[%s3587_s4 + $0x68] sm:$0xff] }
  0xb5   : > { %1134 = vmatpush.msrb.mxu2 %v1069_v50 }
  0xb6   : > { %851 = vmatpush.msrb.mxu0 %v655_v53 }
  0xb7   : > { %v482_v14 = vpop.f32.mrf.mxu1 }
  0xb8   : > { %v2750_v62 = vpop.f32.mrf.mxu0  ;;  %852 = vmatpush.msrb.mxu0 %v654_v55 }
  0xba   : > { %853 = vmatpush.msrb.mxu0 %v653_v58 }
  0xbb   : > { %2202 = vmatmul.msk.f32.gmra.mxu0 %vm333_vm0, %v286_v63  ;;  %v665_v63 = vld [vmem:[#allocation2 + $0xa1] sm:$0xff] }
  0xbf   : > { %v485_v26 = vpop.f32.mrf.mxu1 }
  0xc0   : > { %v405_v4 = vpop.f32.mrf.mxu0 }
  0xc1   : > { %v471_v5 = vadd.f32 %v2684_v47, %v405_v4 }
  0xc3   : > { %v518_v8 = vmul.f32 %v2777_v3, %v471_v5 }
  0xc5   : > { %v538_v9 = vadd.f32 %v2787_v6, %v518_v8 }
  0xc7   : > { %2023 = vrot.lane.b32.xlu1 %v538_v9, %s2490_s17  ;;  %v554_v10 = vmax.f32 %v538_v9, 0.0  ;;  %v488_v38 = vpop.f32.mrf.mxu1 }
  0xc8   : > { %v408_v11 = vpop.f32.mrf.mxu0 }
  0xc9   : > { %623 = vst.msk [vmem:[#allocation2 + $0x31] sm:$0xff] %vm568_vm2, %v554_v10  ;;  %v474_v12 = vadd.f32 %v2715_v56, %v408_v11 }
  0xcb   : > { %v519_v13 = vmul.f32 %v2777_v3, %v474_v12 }
  0xcd   : > { %v539_v15 = vadd.f32 %v2787_v6, %v519_v13 }
  0xcf   : > { %2025 = vrot.lane.b32.xlu1 %v539_v15, %s2490_s17  ;;  %v555_v16 = vmax.f32 %v539_v15, 0.0  ;;  %v491_v47 = vpop.f32.mrf.mxu1  ;;  %v1068_v15 = vld [vmem:[%s3587_s4 + $0x60] sm:$0xff] }
  0xd0   : > { %v411_v17 = vpop.f32.mrf.mxu0  ;;  %v2825_v18 = vld [vmem:[#allocation2 + $0x31] sm:$0xff]  ;;  %1135 = vmatpush.msrb.mxu2 %v1068_v15 }
  0xd1   : > { %v2827_v19 = vld [vmem:[#allocation2 + $0x30] sm:$0xff]  ;;  %624 = vst.msk [vmem:[#allocation2 + $0x41] sm:$0xff] %vm568_vm2, %v555_v16  ;;  %v477_v20 = vadd.f32 %v476_v0, %v411_v17  ;;  %2220 = vmatmul.msk.f32.vlgmr.msra.gmra.mxu2 %vm568_vm2, %v2825_v18  ;;  %v645_v0 = vld [vmem:[#allocation2 + $0xa0] sm:$0xff] }
  0xd2   : > { %2236 = vmatmul.msk.f32.vlgmr.msra.gmra.mxu3 %vm568_vm2, %v2827_v19 }
  0xd3   : > { %v520_v21 = vmul.f32 %v2777_v3, %v477_v20 }
  0xd5   : > { %v540_v25 = vadd.f32 %v2787_v6, %v520_v21 }
  0xd7   : > { %2027 = vrot.lane.b32.xlu2 %v540_v25, %s2490_s17  ;;  %v556_v27 = vmax.f32 %v540_v25, 0.0  ;;  %v494_v60 = vpop.f32.mrf.mxu1 }
  0xd8   : > { %v414_v28 = vpop.f32.mrf.mxu0  ;;  %v2860_v29 = vld [vmem:[#allocation2 + $0x41] sm:$0xff] }
  0xd9   : > { %v2862_v30 = vld [vmem:[#allocation2 + $0x40] sm:$0xff]  ;;  %625 = vst.msk [vmem:[#allocation2 + $0x51] sm:$0xff] %vm568_vm2, %v556_v27  ;;  %v480_v31 = vadd.f32 %v479_v7, %v414_v28  ;;  %2221 = vmatmul.msk.f32.gmra.mxu2 %vm568_vm2, %v2860_v29 }
  0xda   : > { %2237 = vmatmul.msk.f32.gmra.mxu3 %vm568_vm2, %v2862_v30  ;;  %v1217_v27 = vld [vmem:[%s3587_s4 + $0x80] sm:$0xff] }
  0xdb   : > { %v521_v32 = vmul.f32 %v2777_v3, %v480_v31  ;;  %1284 = vmatpush.msrb.mxu3 %v1217_v27 }
  0xdd   : > { %v541_v33 = vadd.f32 %v2787_v6, %v521_v32 }
  0xdf   : > { %2029 = vrot.lane.b32.xlu2 %v541_v33, %s2490_s17  ;;  %v557_v34 = vmax.f32 %v541_v33, 0.0  ;;  %v497_v8 = vpop.f32.mrf.mxu1 }
  0xe0   : > { %v417_v35 = vpop.f32.mrf.mxu0  ;;  %v2878_v36 = vld [vmem:[#allocation2 + $0x51] sm:$0xff] }
  0xe1   : > { %v2880_v37 = vld [vmem:[#allocation2 + $0x50] sm:$0xff]  ;;  %626 = vst.msk [vmem:[#allocation2 + $0x61] sm:$0xff] %vm568_vm2, %v557_v34  ;;  %v483_v39 = vadd.f32 %v482_v14, %v417_v35  ;;  %2222 = vmatmul.msk.f32.gmra.mxu2 %vm568_vm2, %v2878_v36 }
  0xe2   : > { %2238 = vmatmul.msk.f32.gmra.mxu3 %vm568_vm2, %v2880_v37 }
  0xe3   : > { %v522_v40 = vmul.f32 %v2777_v3, %v483_v39 }
  0xe5   : > { %v542_v41 = vadd.f32 %v2787_v6, %v522_v40 }
  0xe7   : > { %2031 = vrot.lane.b32.xlu0 %v542_v41, %s2490_s17  ;;  %v558_v42 = vmax.f32 %v542_v41, 0.0  ;;  %v500_v23 = vpop.f32.mrf.mxu1 }
  0xe8   : > { %v420_v43 = vpop.f32.mrf.mxu0  ;;  %v2890_v44 = vld [vmem:[#allocation2 + $0x61] sm:$0xff] }
  0xe9   : > { %v2892_v45 = vld [vmem:[#allocation2 + $0x60] sm:$0xff]  ;;  %627 = vst.msk [vmem:[#allocation2 + $0x71] sm:$0xff] %vm568_vm2, %v558_v42  ;;  %v486_v46 = vadd.f32 %v485_v26, %v420_v43  ;;  %2223 = vmatmul.msk.f32.gmra.mxu2 %vm568_vm2, %v2890_v44 }
  0xea   : > { %2239 = vmatmul.msk.f32.gmra.mxu3 %vm568_vm2, %v2892_v45  ;;  %v919_v26 = vld [vmem:[%s3587_s4 + $0x40] sm:$0xff] }
  0xeb   : > { %v523_v48 = vmul.f32 %v2777_v3, %v486_v46  ;;  %986 = vmatpush.msrb.mxu1 %v919_v26 }
  0xec   : > { %2249 = vmatmul.msk.f32.vlgmr.msrb.gmra.mxu1 %vm568_vm2, %v903_v49 }
  0xed   : > { %v543_v52 = vadd.f32 %v2787_v6, %v523_v48 }
  0xef   : > { %2033 = vrot.lane.b32.xlu1 %v543_v52, %s2490_s17  ;;  %v559_v53 = vmax.f32 %v543_v52, 0.0 }
  0xf0   : > { %v423_v54 = vpop.f32.mrf.mxu0  ;;  %v2911_v55 = vld [vmem:[#allocation2 + $0x71] sm:$0xff] }
  0xf1   : > { %v2913_v56 = vld [vmem:[#allocation2 + $0x70] sm:$0xff]  ;;  %628 = vst.msk [vmem:[#allocation2 + $0x81] sm:$0xff] %vm568_vm2, %v559_v53  ;;  %v489_v57 = vadd.f32 %v488_v38, %v423_v54  ;;  %2224 = vmatmul.msk.f32.gmra.mxu2 %vm568_vm2, %v2911_v55  ;;  %v503_v38 = vpop.f32.mrf.mxu1 }
  0xf2   : > { %2240 = vmatmul.msk.f32.gmra.mxu3 %vm568_vm2, %v2913_v56 }
  0xf3   : > { %v524_v58 = vmul.f32 %v2777_v3, %v489_v57 }
  0xf5   : > { %v544_v61 = vadd.f32 %v2787_v6, %v524_v58 }
  0xf7   : > { %2035 = vrot.lane.b32.xlu2 %v544_v61, %s2490_s17  ;;  %v560_v1 = vmax.f32 %v544_v61, 0.0  ;;  %v1668_v61 = vld [vmem:[%s3587_s4 + $0xf8] sm:$0xff] }
  0xf8   : > { %v426_v2 = vpop.f32.mrf.mxu0  ;;  %1729 = vmatpush.msra.mxu2 %v1668_v61 }
  0xf9   : > { %629 = vst.msk [vmem:[#allocation2 + $0xb1] sm:$0xff] %vm568_vm2, %v560_v1  ;;  %v492_v4 = vadd.f32 %v491_v47, %v426_v2  ;;  %2225 = vmatmul.msk.f32.gmra.mxu2 %vm568_vm2, %v665_v63  ;;  %v657_v47 = vld [vmem:[#allocation2 + $0x1] sm:$0xff]  ;;  %v506_v51 = vpop.f32.mrf.mxu1  ;;  %v1817_v63 = vld [vmem:[%s3587_s4 + $0x118] sm:$0xff] }
  0xfa   : > { %2241 = vmatmul.msk.f32.gmra.mxu3 %vm568_vm2, %v645_v0  ;;  %2217 = vmatmul.msk.f32.vlgmr.msra.gmra.mxu0 %vm568_vm2, %v657_v47  ;;  %v1519_v0 = vld [vmem:[%s3587_s4 + $0xd8] sm:$0xff]  ;;  %v1366_v47 = vld [vmem:[%s3587_s4 + $0xa0] sm:$0xff] }
  0xfb   : > { %v525_v5 = vmul.f32 %v2777_v3, %v492_v4  ;;  %1878 = vmatpush.msra.mxu3 %v1817_v63  ;;  %1580 = vmatpush.msra.mxu1 %v1519_v0  ;;  %v1666_v0 = vld [vmem:[%s3587_s4 + $0xe8] sm:$0xff] }
  0xfd   : > { %v545_v7 = vadd.f32 %v2787_v6, %v525_v5 }
  0xff   : > { %2037 = vrot.lane.b32.xlu0 %v545_v7, %s2490_s17  ;;  %v561_v9 = vmax.f32 %v545_v7, 0.0 }
 0x100   : > { %v429_v10 = vpop.f32.mrf.mxu0  ;;  %v2929_v11 = vld [vmem:[#allocation2 + $0xb1] sm:$0xff] }
 0x101   : > { %v2931_v12 = vld [vmem:[#allocation2 + $0xb0] sm:$0xff]  ;;  %630 = vst.msk [vmem:[#allocation2 + $0xc1] sm:$0xff] %vm568_vm2, %v561_v9  ;;  %v495_v13 = vadd.f32 %v494_v60, %v429_v10  ;;  %2226 = vmatmul.msk.f32.gmra.mxu2 %vm568_vm2, %v2929_v11  ;;  %v509_v4 = vpop.f32.mrf.mxu1 }
 0x102   : > { %2242 = vmatmul.msk.f32.gmra.mxu3 %vm568_vm2, %v2931_v12 }
 0x103   : > { %v526_v14 = vmul.f32 %v2777_v3, %v495_v13 }
 0x105   : > { %v546_v16 = vadd.f32 %v2787_v6, %v526_v14 }
 0x107   : > { %2039 = vrot.lane.b32.xlu1 %v546_v16, %s2490_s17  ;;  %v562_v17 = vmax.f32 %v546_v16, 0.0 }
 0x108   : > { %v432_v20 = vpop.f32.mrf.mxu0  ;;  %v2944_v21 = vld [vmem:[#allocation2 + $0xc1] sm:$0xff] }
 0x109   : > { %v2946_v22 = vld [vmem:[#allocation2 + $0xc0] sm:$0xff]  ;;  %631 = vst.msk [vmem:[#allocation2 + $0xd1] sm:$0xff] %vm568_vm2, %v562_v17  ;;  %v498_v24 = vadd.f32 %v497_v8, %v432_v20  ;;  %2227 = vmatmul.msk.f32.gmra.mxu2 %vm568_vm2, %v2944_v21 }
 0x10a   : > { %2243 = vmatmul.msk.f32.gmra.mxu3 %vm568_vm2, %v2946_v22 }
 0x10b   : > { %v527_v25 = vmul.f32 %v2777_v3, %v498_v24 }
 0x10d   : > { %v547_v28 = vadd.f32 %v2787_v6, %v527_v25 }
 0x10f   : > { %2041 = vrot.lane.b32.xlu2 %v547_v28, %s2490_s17  ;;  %v563_v31 = vmax.f32 %v547_v28, 0.0 }
 0x110   : > { %v435_v32 = vpop.f32.mrf.mxu0  ;;  %v2962_v33 = vld [vmem:[#allocation2 + $0xd1] sm:$0xff] }
 0x111   : > { %v2964_v34 = vld [vmem:[#allocation2 + $0xd0] sm:$0xff]  ;;  %632 = vst.msk [vmem:[#allocation2 + $0xe1] sm:$0xff] %vm568_vm2, %v563_v31  ;;  %v501_v35 = vadd.f32 %v500_v23, %v435_v32  ;;  %2228 = vmatmul.msk.f32.gmra.mxu2 %vm568_vm2, %v2962_v33 }
 0x112   : > { %2244 = vmatmul.msk.f32.gmra.mxu3 %vm568_vm2, %v2964_v34  ;;  %v1667_v32 = vld [vmem:[%s3587_s4 + $0xf0] sm:$0xff] }
 0x113   : > { %v528_v39 = vmul.f32 %v2777_v3, %v501_v35  ;;  %1730 = vmatpush.msra.mxu2 %v1667_v32  ;;  %v1814_v32 = vld [vmem:[%s3587_s4 + $0x100] sm:$0xff] }
 0x115   : > { %v548_v40 = vadd.f32 %v2787_v6, %v528_v39  ;;  %1731 = vmatpush.msra.mxu2 %v1666_v0  ;;  %v3234_v0 = vld [vmem:[#allocation2 + $0x82] sm:$0xff] }
 0x117   : > { %2043 = vrot.lane.b32.xlu0 %v548_v40, %s2490_s17  ;;  %v564_v41 = vmax.f32 %v548_v40, 0.0 }
 0x118   : > { %v438_v42 = vpop.f32.mrf.mxu0  ;;  %v2974_v43 = vld [vmem:[#allocation2 + $0xe1] sm:$0xff] }
 0x119   : > { %v2976_v46 = vld [vmem:[#allocation2 + $0xe0] sm:$0xff]  ;;  %633 = vst.msk [vmem:[#allocation2 + $0xf1] sm:$0xff] %vm568_vm2, %v564_v41  ;;  %v504_v48 = vadd.f32 %v503_v38, %v438_v42  ;;  %2229 = vmatmul.msk.f32.gmra.mxu2 %vm568_vm2, %v2974_v43  ;;  %v1518_v41 = vld [vmem:[%s3587_s4 + $0xd0] sm:$0xff]  ;;  %v1367_v42 = vld [vmem:[%s3587_s4 + $0xa8] sm:$0xff] }
 0x11a   : > { %2245 = vmatmul.msk.f32.gmra.mxu3 %vm568_vm2, %v2976_v46  ;;  %1581 = vmatpush.msra.mxu1 %v1518_v41  ;;  %v3218_v41 = vld [vmem:[#allocation2 + $0xe2] sm:$0xff] }
 0x11b   : > { %v529_v50 = vmul.f32 %v2777_v3, %v504_v48 }
 0x11d   : > { %v549_v52 = vadd.f32 %v2787_v6, %v529_v50 }
 0x11f   : > { %2045 = vrot.lane.b32.xlu1 %v549_v52, %s2490_s17  ;;  %v565_v53 = vmax.f32 %v549_v52, 0.0  ;;  %v3079_v52 = vld [vmem:[#allocation2 + $0x32] sm:$0xff] }
 0x120   : > { %v441_v54 = vpop.f32.mrf.mxu0  ;;  %v2988_v57 = vld [vmem:[#allocation2 + $0xf1] sm:$0xff] }
 0x121   : > { %3600 = vst [vmem:[#allocation6_spill] sm:$0xff] %v2988_v57  ;;  %v2990_v58 = vld [vmem:[#allocation2 + $0xf0] sm:$0xff]  ;;  %v507_v60 = vadd.f32 %v506_v51, %v441_v54  ;;  %2230 = vmatmul.msk.f32.gmra.mxu2 %vm568_vm2, %v2988_v57  ;;  %v637_v51 = vld [vmem:[#allocation2] sm:$0xff] }
 0x122   : > { %634 = vst.msk [vmem:[#allocation2 + $0x101] sm:$0xff] %vm568_vm2, %v565_v53  ;;  %2246 = vmatmul.msk.f32.gmra.mxu3 %vm568_vm2, %v2990_v58 }
 0x123   : > { %v530_v1 = vmul.f32 %v2777_v3, %v507_v60  ;;  %v3092_v60 = vld [vmem:[#allocation2 + $0x42] sm:$0xff] }
 0x125   : > { %v550_v2 = vadd.f32 %v2787_v6, %v530_v1  ;;  %v3108_v1 = vld [vmem:[#allocation2 + $0x52] sm:$0xff] }
 0x127   : > { %2047 = vrot.lane.b32.xlu2 %v550_v2, %s2490_s17  ;;  %v566_v5 = vmax.f32 %v550_v2, 0.0  ;;  %v1815_v2 = vld [vmem:[%s3587_s4 + $0x108] sm:$0xff] }
 0x128   : > { %v444_v7 = vpop.f32.mrf.mxu0 }
 0x129   : > { %v3009_v8 = vld [vmem:[#allocation2 + $0x101] sm:$0xff]  ;;  %635 = vst.msk [vmem:[#allocation2 + $0x111] sm:$0xff] %vm568_vm2, %v566_v5  ;;  %v510_v10 = vadd.f32 %v509_v4, %v444_v7 }
 0x12a   : > { %3601 = vst [vmem:[#allocation7_spill] sm:$0xff] %v3009_v8  ;;  %v3011_v9 = vld [vmem:[#allocation2 + $0x100] sm:$0xff]  ;;  %2231 = vmatmul.msk.f32.gmra.mxu2 %vm568_vm2, %v3009_v8  ;;  %v1517_v7 = vld [vmem:[%s3587_s4 + $0xc8] sm:$0xff] }
 0x12b   : > { %2247 = vmatmul.msk.f32.gmra.mxu3 %vm568_vm2, %v3011_v9  ;;  %v531_v13 = vmul.f32 %v2777_v3, %v510_v10  ;;  %1582 = vmatpush.msra.mxu1 %v1517_v7  ;;  %v3128_v10 = vld [vmem:[#allocation2 + $0x62] sm:$0xff] }
 0x12d   : > { %v551_v14 = vadd.f32 %v2787_v6, %v531_v13 }
 0x12f   : > { %v567_v15 = vmax.f32 %v551_v14, 0.0 }
 0x130   : > { %v464_v16 = vpop.f32.mrf.mxu0  ;;  %v3020_v17 = vld [vmem:[#allocation2 + $0x111] sm:$0xff] }
 0x131   : > { %3602 = vst [vmem:[#allocation8_spill] sm:$0xff] %v3020_v17  ;;  %v3022_v20 = vld [vmem:[#allocation2 + $0x110] sm:$0xff]  ;;  %v465_v23 = vadd.f32 %v464_v16, %v2727_v59 }
 0x132   : > { %3603 = vst [vmem:[#allocation9_spill] sm:$0xff] %v3022_v20  ;;  %2232 = vmatmul.msk.f32.gmra.mxu2 %vm568_vm2, %v3020_v17 }
 0x133   : > { %2248 = vmatmul.msk.f32.gmra.mxu3 %vm568_vm2, %v3022_v20  ;;  %636 = vst.msk [vmem:[#allocation2 + $0x121] sm:$0xff] %vm568_vm2, %v567_v15  ;;  %v516_v24 = vmul.f32 %v2777_v3, %v465_v23  ;;  %v3141_v15 = vld [vmem:[#allocation2 + $0x72] sm:$0xff] }
 0x135   : > { %v536_v25 = vadd.f32 %v2787_v6, %v516_v24  ;;  %v911_v24 = vld [vmem:[#allocation2 + $0xa2] sm:$0xff] }
 0x137   : > { %2019 = vrot.lane.b32.xlu0 %v536_v25, %s2490_s17  ;;  %v552_v26 = vmax.f32 %v536_v25, 0.0  ;;  %v3156_v25 = vld [vmem:[#allocation2 + $0x80] sm:$0xff] }
 0x138   : > { %v467_v27 = vpop.f32.mrf.mxu0 }
 0x139   : > { %621 = vst.msk [vmem:[#allocation2 + $0x11] sm:$0xff] %vm568_vm2, %v552_v26  ;;  %v468_v59 = vadd.f32 %v467_v27, %v2750_v62  ;;  %v1369_v62 = vld [vmem:[%s3587_s4 + $0xb8] sm:$0xff]  ;;  %v3158_v26 = vld [vmem:[#allocation2 + $0x81] sm:$0xff] }
 0x13a   : > { %1430 = vmatpush.msra.mxu0 %v1369_v62  ;;  %v3204_v62 = vld [vmem:[#allocation2 + $0xd2] sm:$0xff] }
 0x13b   : > { %v517_v28 = vmul.f32 %v2777_v3, %v468_v59  ;;  %v1816_v3 = vld [vmem:[%s3587_s4 + $0x110] sm:$0xff] }
 0x13c   : > { %1879 = vmatpush.msra.mxu3 %v1816_v3 }
 0x13d   : > { %v537_v31 = vadd.f32 %v2787_v6, %v517_v28  ;;  %v1368_v6 = vld [vmem:[%s3587_s4 + $0xb0] sm:$0xff] }
 0x13e   : > { %1431 = vmatpush.msra.mxu0 %v1368_v6  ;;  %1880 = vmatpush.msra.mxu3 %v1815_v2  ;;  %v912_v28 = vld [vmem:[#allocation2 + $0xb2] sm:$0xff]  ;;  %v3244_v2 = vld [vmem:[#allocation2 + $0x102] sm:$0xff] }
 0x13f   : > { %v553_v35 = vmax.f32 %v537_v31, 0.0  ;;  %2021 = vrot.lane.b32.xlu0 %v537_v31, %s2490_s17  ;;  %v1665_v31 = vld [vmem:[%s3587_s4 + $0xe0] sm:$0xff] }
 0x140   : > { %v658_v38 = vld [vmem:[#allocation2 + $0x11] sm:$0xff]  ;;  %1432 = vmatpush.msra.mxu0 %v1367_v42  ;;  %1732 = vmatpush.msra.mxu2 %v1665_v31 }
 0x141   : > { %v904_v39 = vld [vmem:[#allocation2 + $0x12] sm:$0xff]  ;;  %622 = vst.msk [vmem:[#allocation2 + $0x21] sm:$0xff] %vm568_vm2, %v553_v35  ;;  %2218 = vmatmul.msk.f32.gmra.mxu0 %vm568_vm2, %v658_v38  ;;  %2281 = vmatmul.msk.f32.vlgmr.msrb.gmra.mxu3 %vm568_vm2, %v658_v38 }
 0x142   : > { %v1052_v40 = vld [vmem:[#allocation2 + $0x10] sm:$0xff]  ;;  %2250 = vmatmul.msk.f32.gmra.mxu1 %vm568_vm2, %v904_v39  ;;  %1433 = vmatpush.msra.mxu0 %v1366_v47 }
 0x143   : > { %2265 = vmatmul.msk.f32.vlgmr.msrb.gmra.mxu2 %vm568_vm2, %v1052_v40  ;;  %1881 = vmatpush.msra.mxu3 %v1814_v32  ;;  %v3257_v31 = vld [vmem:[#allocation2 + $0x112] sm:$0xff] }
 0x147   : > { %2049 = vrot.lane.b32.xlu0 %v551_v14, %s2490_s17 }
 0x148   : > { %v3065_v48 = vld [vmem:[#allocation2 + $0x21] sm:$0xff] }
 0x149   : > { %v3067_v49 = vld [vmem:[#allocation2 + $0x22] sm:$0xff]  ;;  %2219 = vmatmul.msk.f32.gmra.mxu0 %vm568_vm2, %v3065_v48  ;;  %2282 = vmatmul.msk.f32.gmra.mxu3 %vm568_vm2, %v3065_v48 }
 0x14a   : > { %v3069_v50 = vld [vmem:[#allocation2 + $0x20] sm:$0xff]  ;;  %2251 = vmatmul.msk.f32.gmra.mxu1 %vm568_vm2, %v3067_v49 }
 0x14b   : > { %2266 = vmatmul.msk.f32.gmra.mxu2 %vm568_vm2, %v3069_v50 }
 0x151   : > { %2233 = vmatmul.msk.f32.vlgmr.msrb.gmra.mxu0 %vm568_vm2, %v637_v51  ;;  %2283 = vmatmul.msk.f32.gmra.mxu3 %vm568_vm2, %v2825_v18  ;;  %v3232_v51 = vld [vmem:[#allocation2 + $0xf2] sm:$0xff] }
 0x152   : > { %2252 = vmatmul.msk.f32.gmra.mxu1 %vm568_vm2, %v3079_v52  ;;  %3606 = vst [vmem:[#allocation12_spill] sm:$0xff] %v3232_v51 }
 0x153   : > { %2267 = vmatmul.msk.f32.gmra.mxu2 %vm568_vm2, %v2827_v19 }
 0x154   : > { %v3088_v53 = vpop.f32.mrf.mxu2 }
 0x155   : > { %v3090_v54 = vpop.f32.mrf.mxu3 }
 0x159   : > { %2234 = vmatmul.msk.f32.gmra.mxu0 %vm568_vm2, %v1052_v40  ;;  %2284 = vmatmul.msk.f32.gmra.mxu3 %vm568_vm2, %v2860_v29 }
 0x15a   : > { %2253 = vmatmul.msk.f32.gmra.mxu1 %vm568_vm2, %v3092_v60 }
 0x15b   : > { %2268 = vmatmul.msk.f32.gmra.mxu2 %vm568_vm2, %v2862_v30 }
 0x15c   : > { %v3101_v61 = vpop.f32.mrf.mxu2 }
 0x15d   : > { %v3103_v63 = vpop.f32.mrf.mxu3 }
 0x161   : > { %2235 = vmatmul.msk.f32.gmra.mxu0 %vm568_vm2, %v3069_v50  ;;  %2285 = vmatmul.msk.f32.gmra.mxu3 %vm568_vm2, %v2878_v36 }
 0x162   : > { %2254 = vmatmul.msk.f32.gmra.mxu1 %vm568_vm2, %v3108_v1 }
 0x163   : > { %2269 = vmatmul.msk.f32.gmra.mxu2 %vm568_vm2, %v2880_v37 }
 0x164   : > { %v3121_v4 = vpop.f32.mrf.mxu2 }
 0x165   : > { %v3123_v5 = vpop.f32.mrf.mxu3 }
 0x169   : > { %2297 = vmatmul.msk.f32.vlgmr.msra.gmra.mxu0 %vm568_vm2, %v904_v39  ;;  %2286 = vmatmul.msk.f32.gmra.mxu3 %vm568_vm2, %v2890_v44 }
 0x16a   : > { %2255 = vmatmul.msk.f32.gmra.mxu1 %vm568_vm2, %v3128_v10 }
 0x16b   : > { %2270 = vmatmul.msk.f32.gmra.mxu2 %vm568_vm2, %v2892_v45 }
 0x16c   : > { %v3137_v13 = vpop.f32.mrf.mxu2 }
 0x16d   : > { %v3139_v14 = vpop.f32.mrf.mxu3 }
 0x171   : > { %2298 = vmatmul.msk.f32.gmra.mxu0 %vm568_vm2, %v3067_v49  ;;  %2287 = vmatmul.msk.f32.gmra.mxu3 %vm568_vm2, %v2911_v55 }
 0x172   : > { %2256 = vmatmul.msk.f32.gmra.mxu1 %vm568_vm2, %v3141_v15 }
 0x173   : > { %2271 = vmatmul.msk.f32.gmra.mxu2 %vm568_vm2, %v2913_v56 }
 0x174   : > { %v3151_v16 = vpop.f32.mrf.mxu2 }
 0x175   : > { %v3153_v23 = vpop.f32.mrf.mxu3 }
 0x179   : > { %2299 = vmatmul.msk.f32.gmra.mxu0 %vm568_vm2, %v3079_v52  ;;  %2288 = vmatmul.msk.f32.gmra.mxu3 %vm568_vm2, %v3158_v26 }
 0x17a   : > { %2257 = vmatmul.msk.f32.gmra.mxu1 %vm568_vm2, %v911_v24 }
 0x17b   : > { %2272 = vmatmul.msk.f32.gmra.mxu2 %vm568_vm2, %v3156_v25 }
 0x17c   : > { %v3166_v27 = vpop.f32.mrf.mxu2 }
 0x17d   : > { %v3168_v59 = vpop.f32.mrf.mxu3 }
 0x181   : > { %2300 = vmatmul.msk.f32.gmra.mxu0 %vm568_vm2, %v3092_v60  ;;  %2289 = vmatmul.msk.f32.gmra.mxu3 %vm568_vm2, %v2929_v11  ;;  %v3190_v11 = vld [vmem:[#allocation2 + $0xc2] sm:$0xff] }
 0x182   : > { %2258 = vmatmul.msk.f32.gmra.mxu1 %vm568_vm2, %v912_v28 }
 0x183   : > { %2273 = vmatmul.msk.f32.gmra.mxu2 %vm568_vm2, %v2931_v12  ;;  %v1516_v12 = vld [vmem:[%s3587_s4 + $0xc0] sm:$0xff] }
 0x184   : > { %v3183_v35 = vpop.f32.mrf.mxu2  ;;  %1583 = vmatpush.msra.mxu1 %v1516_v12  ;;  %v742_v12 = vpop.f32.mrf.mxu0 }
 0x185   : > { %v3185_v38 = vpop.f32.mrf.mxu3 }
 0x189   : > { %2301 = vmatmul.msk.f32.gmra.mxu0 %vm568_vm2, %v3108_v1  ;;  %2290 = vmatmul.msk.f32.gmra.mxu3 %vm568_vm2, %v2944_v21 }
 0x18a   : > { %2259 = vmatmul.msk.f32.gmra.mxu1 %vm568_vm2, %v3190_v11 }
 0x18b   : > { %2274 = vmatmul.msk.f32.gmra.mxu2 %vm568_vm2, %v2946_v22 }
 0x18c   : > { %v3200_v39 = vpop.f32.mrf.mxu2 }
 0x18d   : > { %v3202_v40 = vpop.f32.mrf.mxu3 }
 0x191   : > { %2302 = vmatmul.msk.f32.gmra.mxu0 %vm568_vm2, %v3128_v10  ;;  %2291 = vmatmul.msk.f32.gmra.mxu3 %vm568_vm2, %v2962_v33 }
 0x192   : > { %2260 = vmatmul.msk.f32.gmra.mxu1 %vm568_vm2, %v3204_v62 }
 0x193   : > { %2275 = vmatmul.msk.f32.gmra.mxu2 %vm568_vm2, %v2964_v34 }
 0x194   : > { %v3214_v3 = vpop.f32.mrf.mxu2 }
 0x195   : > { %v3216_v6 = vpop.f32.mrf.mxu3 }
 0x199   : > { %2303 = vmatmul.msk.f32.gmra.mxu0 %vm568_vm2, %v3141_v15  ;;  %2292 = vmatmul.msk.f32.gmra.mxu3 %vm568_vm2, %v2974_v43 }
 0x19a   : > { %2261 = vmatmul.msk.f32.gmra.mxu1 %vm568_vm2, %v3218_v41 }
 0x19b   : > { %2276 = vmatmul.msk.f32.gmra.mxu2 %vm568_vm2, %v2976_v46 }
 0x19c   : > { %v3228_v42 = vpop.f32.mrf.mxu2 }
 0x19d   : > { %3604 = vst [vmem:[#allocation10_spill] sm:$0xff] %v3228_v42  ;;  %v3230_v47 = vpop.f32.mrf.mxu3 }
 0x19e   : > { %3605 = vst [vmem:[#allocation11_spill] sm:$0xff] %v3230_v47 }
 0x1a1   : > { %2304 = vmatmul.msk.f32.gmra.mxu0 %vm568_vm2, %v3234_v0  ;;  %2293 = vmatmul.msk.f32.gmra.mxu3 %vm568_vm2, %v2988_v57 }
 0x1a2   : > { %2262 = vmatmul.msk.f32.gmra.mxu1 %vm568_vm2, %v3232_v51 }
 0x1a3   : > { %2277 = vmatmul.msk.f32.gmra.mxu2 %vm568_vm2, %v2990_v58 }
 0x1a4   : > { %v3246_v7 = vpop.f32.mrf.mxu2 }
 0x1a5   : > { %3607 = vst [vmem:[#allocation13_spill] sm:$0xff] %v3246_v7  ;;  %v3248_v24 = vpop.f32.mrf.mxu3  ;;  %v3271_v7 = vld [vmem:[#allocation2 + $0x120] sm:$0xff] }
 0x1a6   : > { %3608 = vst [vmem:[#allocation14_spill] sm:$0xff] %v3248_v24  ;;  %v988_v24 = vpop.f32.mrf.mxu1 }
 0x1a7   : > { %3611 = vst [vmem:[#allocation17_spill] sm:$0xff] %v3271_v7 }
 0x1a9   : > { %2305 = vmatmul.msk.f32.gmra.mxu0 %vm568_vm2, %v912_v28  ;;  %2294 = vmatmul.msk.f32.gmra.mxu3 %vm568_vm2, %v3009_v8  ;;  %v3273_v8 = vld [vmem:[#allocation2 + $0x121] sm:$0xff] }
 0x1aa   : > { %2263 = vmatmul.msk.f32.gmra.mxu1 %vm568_vm2, %v3244_v2  ;;  %3612 = vst [vmem:[#allocation18_spill] sm:$0xff] %v3273_v8 }
 0x1ab   : > { %2278 = vmatmul.msk.f32.gmra.mxu2 %vm568_vm2, %v3011_v9 }
 0x1ad   : > { %v3267_v28 = vpop.f32.mrf.mxu2 }
 0x1ae   : > { %3609 = vst [vmem:[#allocation15_spill] sm:$0xff] %v3267_v28  ;;  %v3269_v32 = vpop.f32.mrf.mxu3 }
 0x1af   : > { %3610 = vst [vmem:[#allocation16_spill] sm:$0xff] %v3269_v32 }
 0x1b1   : > { %2306 = vmatmul.msk.f32.gmra.mxu0 %vm568_vm2, %v3190_v11  ;;  %2295 = vmatmul.msk.f32.gmra.mxu3 %vm568_vm2, %v3020_v17 }
 0x1b2   : > { %2264 = vmatmul.msk.f32.gmra.mxu1 %vm568_vm2, %v3257_v31 }
 0x1b3   : > { %2279 = vmatmul.msk.f32.gmra.mxu2 %vm568_vm2, %v3022_v20 }
 0x1b5   : > { %v3283_v28 = vpop.f32.mrf.mxu2 }
 0x1b6   : > { %3613 = vst [vmem:[#allocation19_spill] sm:$0xff] %v3283_v28  ;;  %v3285_v32 = vpop.f32.mrf.mxu3 }
 0x1b7   : > { %3614 = vst [vmem:[#allocation20_spill] sm:$0xff] %v3285_v32 }
 0x1b9   : > { %2307 = vmatmul.msk.f32.gmra.mxu0 %vm568_vm2, %v3204_v62  ;;  %2296 = vmatmul.msk.f32.gmra.mxu3 %vm568_vm2, %v3273_v8 }
 0x1ba   : > { %2313 = vmatmul.msk.f32.vlgmr.msra.gmra.mxu1 %vm568_vm2, %v3069_v50 }
 0x1bb   : > { %2280 = vmatmul.msk.f32.gmra.mxu2 %vm568_vm2, %v3271_v7 }
 0x1be   : > { %v745_v17 = vpop.f32.mrf.mxu0 }
 0x1bf   : > { %v991_v47 = vpop.f32.mrf.mxu1 }
 0x1c1   : > { %2308 = vmatmul.msk.f32.gmra.mxu0 %vm568_vm2, %v3218_v41  ;;  %2345 = vmatmul.msk.f32.vlgmr.msra.gmra.mxu3 %vm568_vm2, %v3067_v49 }
 0x1c2   : > { %2314 = vmatmul.msk.f32.gmra.mxu1 %vm568_vm2, %v2827_v19 }
 0x1c3   : > { %2329 = vmatmul.msk.f32.vlgmr.msra.gmra.mxu2 %vm568_vm2, %v3065_v48 }
 0x1c4   : > { %v1286_v8 = vpop.f32.mrf.mxu3 }
 0x1c6   : > { %v1137_v50 = vpop.f32.mrf.mxu2  ;;  %v748_v7 = vpop.f32.mrf.mxu0 }
 0x1c7   : > { %v994_v28 = vpop.f32.mrf.mxu1 }
 0x1c9   : > { %2309 = vmatmul.msk.f32.gmra.mxu0 %vm568_vm2, %v3232_v51  ;;  %2346 = vmatmul.msk.f32.gmra.mxu3 %vm568_vm2, %v3079_v52 }
 0x1ca   : > { %2315 = vmatmul.msk.f32.gmra.mxu1 %vm568_vm2, %v2862_v30 }
 0x1cb   : > { %2330 = vmatmul.msk.f32.gmra.mxu2 %vm568_vm2, %v2825_v18 }
 0x1cc   : > { %v1289_v48 = vpop.f32.mrf.mxu3 }
 0x1ce   : > { %v1140_v19 = vpop.f32.mrf.mxu2  ;;  %v855_v32 = vpop.f32.mrf.mxu0 }
 0x1cf   : > { %v997_v49 = vpop.f32.mrf.mxu1  ;;  %v856_v42 = vadd.f32 %v855_v32, %v742_v12 }
 0x1d1   : > { %v1036_v20 = vadd.f32 %v988_v24, %v856_v42  ;;  %2310 = vmatmul.msk.f32.gmra.mxu0 %vm568_vm2, %v3244_v2  ;;  %2347 = vmatmul.msk.f32.gmra.mxu3 %vm568_vm2, %v3092_v60 }
 0x1d2   : > { %2316 = vmatmul.msk.f32.gmra.mxu1 %vm568_vm2, %v2880_v37 }
 0x1d3   : > { %2331 = vmatmul.msk.f32.gmra.mxu2 %vm568_vm2, %v2860_v29  ;;  %v1185_v18 = vadd.f32 %v1137_v50, %v1036_v20  ;;  %v865_v29 = vadd.f32 %v3090_v54, %v3088_v53 }
 0x1d4   : > { %v1292_v52 = vpop.f32.mrf.mxu3 }
 0x1d5   : > { %v3311_v51 = vadd.f32 %v1286_v8, %v1185_v18  ;;  %v1039_v8 = vadd.f32 %v997_v49, %v865_v29  ;;  %v3327_v18 = vld [vmem:[#allocation2 + $0x122] sm:$0xff]  ;;  %v1656_v29 = vld [vmem:[#allocation2 + $0x91] sm:$0xff] }
 0x1d6   : > { %v1143_v30 = vpop.f32.mrf.mxu2  ;;  %v858_v57 = vpop.f32.mrf.mxu0 }
 0x1d7   : > { %v1000_v32 = vpop.f32.mrf.mxu1  ;;  %v859_v42 = vadd.f32 %v858_v57, %v745_v17 }
 0x1d9   : > { %v1037_v24 = vadd.f32 %v991_v47, %v859_v42  ;;  %2311 = vmatmul.msk.f32.gmra.mxu0 %vm568_vm2, %v3257_v31  ;;  %2348 = vmatmul.msk.f32.gmra.mxu3 %vm568_vm2, %v3108_v1 }
 0x1da   : > { %2317 = vmatmul.msk.f32.gmra.mxu1 %vm568_vm2, %v2892_v45 }
 0x1db   : > { %2332 = vmatmul.msk.f32.gmra.mxu2 %vm568_vm2, %v2878_v36  ;;  %v1186_v37 = vadd.f32 %v1140_v19, %v1037_v24  ;;  %v868_v36 = vadd.f32 %v3103_v63, %v3101_v61 }
 0x1dc   : > { %v1295_v57 = vpop.f32.mrf.mxu3 }
 0x1dd   : > { %v3323_v17 = vadd.f32 %v1289_v48, %v1186_v37  ;;  %v1040_v1 = vadd.f32 %v1000_v32, %v868_v36  ;;  %v1805_v37 = vld [vmem:[#allocation2 + $0x92] sm:$0xff] }
 0x1de   : > { %v1146_v20 = vpop.f32.mrf.mxu2  ;;  %v861_v47 = vpop.f32.mrf.mxu0 }
 0x1df   : > { %v1188_v60 = vadd.f32 %v1146_v20, %v1039_v8  ;;  %v1003_v12 = vpop.f32.mrf.mxu1  ;;  %v862_v50 = vadd.f32 %v861_v47, %v748_v7 }
 0x1e1   : > { %v3325_v45 = vadd.f32 %v1295_v57, %v1188_v60  ;;  %v1038_v53 = vadd.f32 %v994_v28, %v862_v50  ;;  %2312 = vmatmul.msk.f32.gmra.mxu0 %vm568_vm2, %v3327_v18  ;;  %2349 = vmatmul.msk.f32.gmra.mxu3 %vm568_vm2, %v3128_v10 }
 0x1e2   : > { %2318 = vmatmul.msk.f32.gmra.mxu1 %vm568_vm2, %v2913_v56  ;;  %v871_v56 = vadd.f32 %v3123_v5, %v3121_v4 }
 0x1e3   : > { %2333 = vmatmul.msk.f32.gmra.mxu2 %vm568_vm2, %v2890_v44  ;;  %v1187_v54 = vadd.f32 %v1143_v30, %v1038_v53 }
 0x1e4   : > { %v1298_v19 = vpop.f32.mrf.mxu3  ;;  %v1041_v44 = vadd.f32 %v1003_v12, %v871_v56 }
 0x1e5   : > { %v3339_v28 = vadd.f32 %v1292_v52, %v1187_v54  ;;  %v1507_v52 = vld [vmem:[#allocation2 + $0x90] sm:$0xff] }
 0x1e6   : > { %v1149_v7 = vpop.f32.mrf.mxu2  ;;  %v1435_v56 = vpop.f32.mrf.mxu0 }
 0x1e7   : > { %v1189_v48 = vadd.f32 %v1149_v7, %v1040_v1  ;;  %v1006_v49 = vpop.f32.mrf.mxu1 }
 0x1e9   : > { %v3341_v42 = vadd.f32 %v1298_v19, %v1189_v48  ;;  %2350 = vmatmul.msk.f32.gmra.mxu3 %vm568_vm2, %v3141_v15 }
 0x1ea   : > { %2319 = vmatmul.msk.f32.gmra.mxu1 %vm568_vm2, %v3156_v25  ;;  %v874_v25 = vadd.f32 %v3139_v14, %v3137_v13  ;;  %v877_v13 = vadd.f32 %v3153_v23, %v3151_v16 }
 0x1eb   : > { %2334 = vmatmul.msk.f32.gmra.mxu2 %vm568_vm2, %v2911_v55 }
 0x1ec   : > { %v1301_v63 = vpop.f32.mrf.mxu3  ;;  %v1042_v55 = vadd.f32 %v1006_v49, %v874_v25 }
 0x1ee   : > { %v1152_v61 = vpop.f32.mrf.mxu2 }
 0x1ef   : > { %v1190_v10 = vadd.f32 %v1152_v61, %v1041_v44  ;;  %v1009_v30 = vpop.f32.mrf.mxu1  ;;  %v3617_v61 = vld [vmem:[#allocation9_spill] sm:$0xff] }
 0x1f0   : > { %v1043_v14 = vadd.f32 %v1009_v30, %v877_v13  ;;  %v3624_v13 = vld [vmem:[#allocation8_spill] sm:$0xff] }
 0x1f1   : > { %v3351_v32 = vadd.f32 %v1301_v63, %v1190_v10  ;;  %2351 = vmatmul.msk.f32.gmra.mxu3 %vm568_vm2, %v3234_v0  ;;  %v3619_v63 = vld [vmem:[#allocation11_spill] sm:$0xff] }
 0x1f2   : > { %2320 = vmatmul.msk.f32.gmra.mxu1 %vm568_vm2, %v1507_v52 }
 0x1f3   : > { %2335 = vmatmul.msk.f32.gmra.mxu2 %vm568_vm2, %v3158_v26 }
 0x1f4   : > { %v1304_v5 = vpop.f32.mrf.mxu3 }
 0x1f6   : > { %v1155_v4 = vpop.f32.mrf.mxu2 }
 0x1f7   : > { %v1191_v15 = vadd.f32 %v1155_v4, %v1042_v55  ;;  %v1012_v24 = vpop.f32.mrf.mxu1 }
 0x1f9   : > { %v3360_v8 = vadd.f32 %v1304_v5, %v1191_v15  ;;  %2352 = vmatmul.msk.f32.gmra.mxu3 %vm568_vm2, %v1805_v37  ;;  %v3621_v5 = vld [vmem:[#allocation17_spill] sm:$0xff]  ;;  %v1438_v37 = vpop.f32.mrf.mxu0 }
 0x1fa   : > { %2321 = vmatmul.msk.f32.gmra.mxu1 %vm568_vm2, %v2946_v22  ;;  %v880_v22 = vadd.f32 %v3168_v59, %v3166_v27  ;;  %v3622_v15 = vld [vmem:[#allocation13_spill] sm:$0xff] }
 0x1fb   : > { %2336 = vmatmul.msk.f32.gmra.mxu2 %vm568_vm2, %v1656_v29 }
 0x1fc   : > { %v1307_v0 = vpop.f32.mrf.mxu3  ;;  %v1044_v16 = vadd.f32 %v1012_v24, %v880_v22  ;;  %v3623_v24 = vld [vmem:[#allocation14_spill] sm:$0xff] }
 0x1fd   : > { %v895_v29 = vadd.f32 %v3623_v24, %v3622_v15 }
 0x1fe   : > { %v1158_v26 = vpop.f32.mrf.mxu2 }
 0x1ff   : > { %v1192_v20 = vadd.f32 %v1158_v26, %v1043_v14  ;;  %v1015_v57 = vpop.f32.mrf.mxu1 }
 0x201   : > { %v3368_v60 = vadd.f32 %v1307_v0, %v1192_v20  ;;  %2353 = vmatmul.msk.f32.gmra.mxu3 %vm568_vm2, %v3190_v11 }
 0x202   : > { %2322 = vmatmul.msk.f32.gmra.mxu1 %vm568_vm2, %v2964_v34  ;;  %v883_v34 = vadd.f32 %v3185_v38, %v3183_v35 }
 0x203   : > { %2337 = vmatmul.msk.f32.gmra.mxu2 %vm568_vm2, %v2944_v21 }
 0x204   : > { %v1310_v47 = vpop.f32.mrf.mxu3  ;;  %v1045_v21 = vadd.f32 %v1015_v57, %v883_v34  ;;  %v1515_v57 = vld [vmem:[#allocation2 + $0x130] sm:$0xff] }
 0x206   : > { %v1161_v23 = vpop.f32.mrf.mxu2 }
 0x207   : > { %v1193_v12 = vadd.f32 %v1161_v23, %v1044_v16  ;;  %v1018_v50 = vpop.f32.mrf.mxu1  ;;  %v3625_v16 = vld [vmem:[#allocation15_spill] sm:$0xff]  ;;  %v3626_v23 = vld [vmem:[#allocation16_spill] sm:$0xff] }
 0x209   : > { %v3378_v53 = vadd.f32 %v1310_v47, %v1193_v12  ;;  %2354 = vmatmul.msk.f32.gmra.mxu3 %vm568_vm2, %v3204_v62  ;;  %v898_v47 = vadd.f32 %v3626_v23, %v3625_v16  ;;  %v3627_v12 = vld [vmem:[#allocation18_spill] sm:$0xff] }
 0x20a   : > { %2323 = vmatmul.msk.f32.gmra.mxu1 %vm568_vm2, %v2976_v46  ;;  %v886_v46 = vadd.f32 %v3202_v40, %v3200_v39  ;;  %v3615_v39 = vld [vmem:[#allocation6_spill] sm:$0xff] }
 0x20b   : > { %2338 = vmatmul.msk.f32.gmra.mxu2 %vm568_vm2, %v2962_v33 }
 0x20c   : > { %v1313_v59 = vpop.f32.mrf.mxu3  ;;  %v1046_v33 = vadd.f32 %v1018_v50, %v886_v46  ;;  %v1441_v50 = vpop.f32.mrf.mxu0  ;;  %v1813_v46 = vld [vmem:[#allocation2 + $0x132] sm:$0xff] }
 0x20e   : > { %v1164_v27 = vpop.f32.mrf.mxu2 }
 0x20f   : > { %v1194_v11 = vadd.f32 %v1164_v27, %v1045_v21  ;;  %v1021_v36 = vpop.f32.mrf.mxu1 }
 0x211   : > { %v3388_v54 = vadd.f32 %v1313_v59, %v1194_v11  ;;  %2355 = vmatmul.msk.f32.gmra.mxu3 %vm568_vm2, %v3218_v41 }
 0x212   : > { %2324 = vmatmul.msk.f32.gmra.mxu1 %vm568_vm2, %v2990_v58  ;;  %v889_v58 = vadd.f32 %v3216_v6, %v3214_v3  ;;  %v3620_v6 = vld [vmem:[#allocation7_spill] sm:$0xff] }
 0x213   : > { %2339 = vmatmul.msk.f32.gmra.mxu2 %vm568_vm2, %v2974_v43  ;;  %v3616_v43 = vld [vmem:[#allocation12_spill] sm:$0xff] }
 0x214   : > { %v1316_v38 = vpop.f32.mrf.mxu3  ;;  %v1047_v40 = vadd.f32 %v1021_v36, %v889_v58  ;;  %v1664_v36 = vld [vmem:[#allocation2 + $0x131] sm:$0xff] }
 0x216   : > { %v1167_v35 = vpop.f32.mrf.mxu2 }
 0x217   : > { %v1195_v62 = vadd.f32 %v1167_v35, %v1046_v33  ;;  %v1024_v1 = vpop.f32.mrf.mxu1  ;;  %v3628_v35 = vld [vmem:[#allocation19_spill] sm:$0xff] }
 0x219   : > { %v3398_v7 = vadd.f32 %v1316_v38, %v1195_v62  ;;  %2356 = vmatmul.msk.f32.gmra.mxu3 %vm568_vm2, %v3616_v43  ;;  %v3629_v38 = vld [vmem:[#allocation20_spill] sm:$0xff]  ;;  %v1444_v43 = vpop.f32.mrf.mxu0 }
 0x21a   : > { %2325 = vmatmul.msk.f32.gmra.mxu1 %vm568_vm2, %v3011_v9  ;;  %v3618_v9 = vld [vmem:[#allocation10_spill] sm:$0xff]  ;;  %v901_v62 = vadd.f32 %v3629_v38, %v3628_v35  ;;  %v2024_v35 = vpop.permute.xlu1 %2023 }
 0x21b   : > { %2340 = vmatmul.msk.f32.gmra.mxu2 %vm568_vm2, %v3615_v39  ;;  %v892_v3 = vadd.f32 %v3619_v63, %v3618_v9 }
 0x21c   : > { %v1319_v19 = vpop.f32.mrf.mxu3 }
 0x21d   : > { %v1048_v10 = vadd.f32 %v1024_v1, %v892_v3 }
 0x21e   : > { %v1170_v41 = vpop.f32.mrf.mxu2 }
 0x21f   : > { %v1196_v48 = vadd.f32 %v1170_v41, %v1047_v40  ;;  %v1027_v49 = vpop.f32.mrf.mxu1 }
 0x221   : > { %v3408_v44 = vadd.f32 %v1319_v19, %v1196_v48  ;;  %2357 = vmatmul.msk.f32.gmra.mxu3 %vm568_vm2, %v3244_v2  ;;  %v1049_v2 = vadd.f32 %v1027_v49, %v895_v29  ;;  %v1483_v48 = vadd.f32 %v1435_v56, %v3311_v51  ;;  %v1484_v51 = vadd.f32 %v1438_v37, %v3323_v17 }
 0x222   : > { %2326 = vmatmul.msk.f32.gmra.mxu1 %vm568_vm2, %v3617_v61 }
 0x223   : > { %2341 = vmatmul.msk.f32.gmra.mxu2 %vm568_vm2, %v3620_v6  ;;  %v3455_v6 = vld [vmem:[%s3588_s5] ss:$0 sm:$0xff] }
 0x224   : > { %v1322_v52 = vpop.f32.mrf.mxu3 }
 0x226   : > { %v1173_v30 = vpop.f32.mrf.mxu2 }
 0x227   : > { %v1197_v25 = vadd.f32 %v1173_v30, %v1048_v10  ;;  %v1030_v55 = vpop.f32.mrf.mxu1  ;;  %v1447_v30 = vpop.f32.mrf.mxu0 }
 0x228   : > { %v1050_v34 = vadd.f32 %v1030_v55, %v898_v47 }
 0x229   : > { %v3418_v4 = vadd.f32 %v1322_v52, %v1197_v25  ;;  %2358 = vmatmul.msk.f32.gmra.mxu3 %vm568_vm2, %v3257_v31  ;;  %v3437_v31 = vpop.permute.xlu0 %2031  ;;  %v3460_v25 = vld [vmem:[%s3589_s6] ss:$0 sm:$0xff] }
 0x22a   : > { %2327 = vmatmul.msk.f32.gmra.mxu1 %vm568_vm2, %v3621_v5 }
 0x22b   : > { %2342 = vmatmul.msk.f32.gmra.mxu2 %vm568_vm2, %v3624_v13 }
 0x22c   : > { %v1325_v26 = vpop.f32.mrf.mxu3 }
 0x22e   : > { %v1176_v14 = vpop.f32.mrf.mxu2 }
 0x22f   : > { %v1198_v0 = vadd.f32 %v1176_v14, %v1049_v2  ;;  %v1033_v20 = vpop.f32.mrf.mxu1 }
 0x230   : > { %v1051_v1 = vadd.f32 %v1033_v20, %v901_v62  ;;  %v1485_v20 = vadd.f32 %v1441_v50, %v3339_v28 }
 0x231   : > { %v3428_v22 = vadd.f32 %v1325_v26, %v1198_v0  ;;  %2359 = vmatmul.msk.f32.gmra.mxu3 %vm568_vm2, %v3327_v18  ;;  %v3445_v18 = vpop.permute.xlu0 %2037 }
 0x232   : > { %2328 = vmatmul.msk.f32.gmra.mxu1 %vm568_vm2, %v1515_v57  ;;  %v1450_v57 = vpop.f32.mrf.mxu0 }
 0x233   : > { %2343 = vmatmul.msk.f32.gmra.mxu2 %vm568_vm2, %v3627_v12 }
 0x234   : > { %v1328_v27 = vpop.f32.mrf.mxu3 }
 0x236   : > { %v1179_v21 = vpop.f32.mrf.mxu2 }
 0x237   : > { %v1199_v59 = vadd.f32 %v1179_v21, %v1050_v34  ;;  %v1585_v11 = vpop.f32.mrf.mxu1 }
 0x238   : > { %v1633_v61 = vadd.f32 %v1585_v11, %v1483_v48  ;;  %v1486_v11 = vadd.f32 %v1444_v43, %v3325_v45  ;;  %v1487_v45 = vadd.f32 %v1447_v30, %v3341_v42  ;;  %v1488_v42 = vadd.f32 %v1450_v57, %v3351_v32 }
 0x239   : > { %v3439_v33 = vadd.f32 %v1328_v27, %v1199_v59  ;;  %2360 = vmatmul.msk.f32.gmra.mxu3 %vm568_vm2, %v1813_v46  ;;  %v3450_v49 = vpop.permute.xlu0 %2043 }
 0x23a   : > { %v1453_v38 = vpop.f32.mrf.mxu0 }
 0x23b   : > { %2344 = vmatmul.msk.f32.gmra.mxu2 %vm568_vm2, %v1664_v36  ;;  %v1489_v32 = vadd.f32 %v1453_v38, %v3360_v8 }
 0x23c   : > { %v1331_v39 = vpop.f32.mrf.mxu3 }
 0x23e   : > { %v1182_v58 = vpop.f32.mrf.mxu2 }
 0x23f   : > { %v1200_v40 = vadd.f32 %v1182_v58, %v1051_v1  ;;  %v1588_v41 = vpop.f32.mrf.mxu1 }
 0x240   : > { %v1634_v5 = vadd.f32 %v1588_v41, %v1484_v51 }
 0x241   : > { %v3447_v19 = vadd.f32 %v1331_v39, %v1200_v40  ;;  %v2020_v55 = vpop.permute.xlu0 %2019 }
 0x244   : > { %v1883_v63 = vpop.f32.mrf.mxu3 }
 0x246   : > { %v1734_v9 = vpop.f32.mrf.mxu2 }
 0x247   : > { %v1782_v3 = vadd.f32 %v1734_v9, %v1633_v61  ;;  %v1591_v10 = vpop.f32.mrf.mxu1 }
 0x248   : > { %v1635_v16 = vadd.f32 %v1591_v10, %v1485_v20 }
 0x249   : > { %v1931_v52 = vadd.f32 %v1883_v63, %v1782_v3  ;;  %v2022_v59 = vpop.permute.xlu0 %2021 }
 0x24b   : > { %v1951_v56 = vmul.f32 %v3455_v6, %v1931_v52 }
 0x24c   : > { %v1886_v29 = vpop.f32.mrf.mxu3 }
 0x24d   : > { %v1971_v15 = vadd.f32 %v3460_v25, %v1951_v56  ;;  %v1456_v56 = vpop.f32.mrf.mxu0 }
 0x24e   : > { %v1737_v24 = vpop.f32.mrf.mxu2 }
 0x24f   : > { %v1987_v13 = vmax.f32 %v1971_v15, 0.0  ;;  %v1783_v2 = vadd.f32 %v1737_v24, %v1634_v5  ;;  %v1594_v14 = vpop.f32.mrf.mxu1  ;;  %v2026_v24 = vpop.permute.xlu1 %2025 }
 0x250   : > { %v1636_v62 = vadd.f32 %v1594_v14, %v1486_v11  ;;  %v2028_v14 = vpop.permute.xlu2 %2027 }
 0x251   : > { %v2067_v26 = vadd.f32 %v2020_v55, %v1987_v13  ;;  %v1932_v0 = vadd.f32 %v1886_v29, %v1783_v2 }
 0x253   : > { %v2083_v17 = vmax.f32 %v2067_v26, 0.0  ;;  %v1952_v37 = vmul.f32 %v3455_v6, %v1932_v0 }
 0x254   : > { %v1889_v12 = vpop.f32.mrf.mxu3 }
 0x255   : > { %2099 = vst.msk [vmem:[%s3470_s15] sm:$0xff] %vm568_vm2, %v2083_v17  ;;  %v1972_v23 = vadd.f32 %v3460_v25, %v1952_v37 }
 0x256   : > { %v1740_v47 = vpop.f32.mrf.mxu2 }
 0x257   : > { %v1988_v34 = vmax.f32 %v1972_v23, 0.0  ;;  %v1784_v21 = vadd.f32 %v1740_v47, %v1635_v16  ;;  %v1597_v27 = vpop.f32.mrf.mxu1  ;;  %v1459_v47 = vpop.f32.mrf.mxu0 }
 0x258   : > { %v1637_v3 = vadd.f32 %v1597_v27, %v1487_v45 }
 0x259   : > { %v2068_v28 = vadd.f32 %v2022_v59, %v1988_v34  ;;  %v1933_v50 = vadd.f32 %v1889_v12, %v1784_v21 }
 0x25b   : > { %v2084_v36 = vmax.f32 %v2068_v28, 0.0  ;;  %v1953_v46 = vmul.f32 %v3455_v6, %v1933_v50 }
 0x25c   : > { %v1892_v39 = vpop.f32.mrf.mxu3 }
 0x25d   : > { %2100 = vst.msk [vmem:[%s3470_s15 + $0x8] sm:$0xff] %vm568_vm2, %v2084_v36  ;;  %v1973_v1 = vadd.f32 %v3460_v25, %v1953_v46 }
 0x25e   : > { %v1743_v58 = vpop.f32.mrf.mxu2 }
 0x25f   : > { %v1989_v40 = vmax.f32 %v1973_v1, 0.0  ;;  %v1785_v41 = vadd.f32 %v1743_v58, %v1636_v62  ;;  %v1600_v48 = vpop.f32.mrf.mxu1  ;;  %v1490_v58 = vadd.f32 %v1456_v56, %v3368_v60  ;;  %v1462_v8 = vpop.f32.mrf.mxu0  ;;  %v1491_v60 = vadd.f32 %v1459_v47, %v3378_v53 }
 0x260   : > { %v1638_v26 = vadd.f32 %v1600_v48, %v1488_v42  ;;  %v2034_v42 = vpop.permute.xlu1 %2033  ;;  %v1492_v53 = vadd.f32 %v1462_v8, %v3388_v54 }
 0x261   : > { %v2069_v61 = vadd.f32 %v2024_v35, %v1989_v40  ;;  %v1934_v9 = vadd.f32 %v1892_v39, %v1785_v41  ;;  %v2030_v35 = vpop.permute.xlu2 %2029 }
 0x263   : > { %v2085_v43 = vmax.f32 %v2069_v61, 0.0  ;;  %v1954_v63 = vmul.f32 %v3455_v6, %v1934_v9 }
 0x264   : > { %v1895_v51 = vpop.f32.mrf.mxu3 }
 0x265   : > { %2101 = vst.msk [vmem:[%s3470_s15 + $0x10] sm:$0xff] %vm568_vm2, %v2085_v43  ;;  %v1974_v10 = vadd.f32 %v3460_v25, %v1954_v63 }
 0x266   : > { %v1746_v52 = vpop.f32.mrf.mxu2 }
 0x267   : > { %v1990_v55 = vmax.f32 %v1974_v10, 0.0  ;;  %v1786_v5 = vadd.f32 %v1746_v52, %v1637_v3  ;;  %v1603_v15 = vpop.f32.mrf.mxu1 }
 0x268   : > { %v1639_v27 = vadd.f32 %v1603_v15, %v1489_v32 }
 0x269   : > { %v2070_v29 = vadd.f32 %v2026_v24, %v1990_v55  ;;  %v1935_v13 = vadd.f32 %v1895_v51, %v1786_v5  ;;  %v1465_v51 = vpop.f32.mrf.mxu0  ;;  %v2036_v47 = vpop.permute.xlu2 %2035 }
 0x26a   : > { %v1493_v54 = vadd.f32 %v1465_v51, %v3398_v7 }
 0x26b   : > { %v2086_v30 = vmax.f32 %v2070_v29, 0.0  ;;  %v1955_v2 = vmul.f32 %v3455_v6, %v1935_v13 }
 0x26c   : > { %v1898_v17 = vpop.f32.mrf.mxu3 }
 0x26d   : > { %2102 = vst.msk [vmem:[%s3470_s15 + $0x18] sm:$0xff] %vm568_vm2, %v2086_v30  ;;  %v1975_v0 = vadd.f32 %v3460_v25, %v1955_v2 }
 0x26e   : > { %v1749_v20 = vpop.f32.mrf.mxu2 }
 0x26f   : > { %v1991_v37 = vmax.f32 %v1975_v0, 0.0  ;;  %v1787_v16 = vadd.f32 %v1749_v20, %v1638_v26  ;;  %v1606_v23 = vpop.f32.mrf.mxu1 }
 0x270   : > { %v1640_v40 = vadd.f32 %v1606_v23, %v1490_v58 }
 0x271   : > { %v2071_v12 = vadd.f32 %v2028_v14, %v1991_v37  ;;  %v1936_v34 = vadd.f32 %v1898_v17, %v1787_v16  ;;  %v1468_v37 = vpop.f32.mrf.mxu0 }
 0x273   : > { %v2087_v57 = vmax.f32 %v2071_v12, 0.0  ;;  %v1956_v21 = vmul.f32 %v3455_v6, %v1936_v34 }
 0x274   : > { %v1901_v50 = vpop.f32.mrf.mxu3 }
 0x275   : > { %2103 = vst.msk [vmem:[%s3470_s15 + $0x20] sm:$0xff] %vm568_vm2, %v2087_v57  ;;  %v1976_v59 = vadd.f32 %v3460_v25, %v1956_v21 }
 0x276   : > { %v1752_v28 = vpop.f32.mrf.mxu2 }
 0x277   : > { %v1992_v11 = vmax.f32 %v1976_v59, 0.0  ;;  %v1788_v36 = vadd.f32 %v1752_v28, %v1639_v27  ;;  %v1609_v46 = vpop.f32.mrf.mxu1 }
 0x278   : > { %v1641_v56 = vadd.f32 %v1609_v46, %v1491_v60 }
 0x279   : > { %v2072_v62 = vadd.f32 %v2030_v35, %v1992_v11  ;;  %v1937_v1 = vadd.f32 %v1901_v50, %v1788_v36  ;;  %v1471_v46 = vpop.f32.mrf.mxu0 }
 0x27b   : > { %v2088_v38 = vmax.f32 %v2072_v62, 0.0  ;;  %v1957_v39 = vmul.f32 %v3455_v6, %v1937_v1  ;;  %v1494_v1 = vadd.f32 %v1468_v37, %v3408_v44 }
 0x27c   : > { %v1904_v61 = vpop.f32.mrf.mxu3 }
 0x27d   : > { %2104 = vst.msk [vmem:[%s3470_s15 + $0x28] sm:$0xff] %vm568_vm2, %v2088_v38  ;;  %v1977_v41 = vadd.f32 %v3460_v25, %v1957_v39 }
 0x27e   : > { %v1755_v48 = vpop.f32.mrf.mxu2 }
 0x27f   : > { %v1993_v9 = vmax.f32 %v1977_v41, 0.0  ;;  %v1789_v45 = vadd.f32 %v1755_v48, %v1640_v40  ;;  %v1612_v43 = vpop.f32.mrf.mxu1 }
 0x280   : > { %v1642_v26 = vadd.f32 %v1612_v43, %v1492_v53  ;;  %v1495_v43 = vadd.f32 %v1471_v46, %v3418_v4 }
 0x281   : > { %v2073_v63 = vadd.f32 %v3437_v31, %v1993_v9  ;;  %v1938_v3 = vadd.f32 %v1904_v61, %v1789_v45  ;;  %v2040_v9 = vpop.permute.xlu1 %2039  ;;  %v1474_v44 = vpop.f32.mrf.mxu0 }
 0x282   : > { %v1496_v4 = vadd.f32 %v1474_v44, %v3428_v22 }
 0x283   : > { %v2089_v10 = vmax.f32 %v2073_v63, 0.0  ;;  %v1958_v52 = vmul.f32 %v3455_v6, %v1938_v3 }
 0x284   : > { %v1907_v15 = vpop.f32.mrf.mxu3 }
 0x285   : > { %2105 = vst.msk [vmem:[%s3470_s15 + $0x30] sm:$0xff] %vm568_vm2, %v2089_v10  ;;  %v1978_v55 = vadd.f32 %v3460_v25, %v1958_v52 }
 0x286   : > { %v1758_v5 = vpop.f32.mrf.mxu2 }
 0x287   : > { %v1994_v24 = vmax.f32 %v1978_v55, 0.0  ;;  %v1790_v29 = vadd.f32 %v1758_v5, %v1641_v56  ;;  %v1615_v13 = vpop.f32.mrf.mxu1 }
 0x288   : > { %v1643_v27 = vadd.f32 %v1615_v13, %v1493_v54 }
 0x289   : > { %v2074_v31 = vadd.f32 %v2034_v42, %v1994_v24  ;;  %v1939_v30 = vadd.f32 %v1907_v15, %v1790_v29  ;;  %v2042_v15 = vpop.permute.xlu2 %2041 }
 0x28b   : > { %v2090_v2 = vmax.f32 %v2074_v31, 0.0  ;;  %v1959_v14 = vmul.f32 %v3455_v6, %v1939_v30  ;;  %v1477_v31 = vpop.f32.mrf.mxu0 }
 0x28c   : > { %v1910_v17 = vpop.f32.mrf.mxu3  ;;  %v1497_v22 = vadd.f32 %v1477_v31, %v3439_v33 }
 0x28d   : > { %2106 = vst.msk [vmem:[%s3470_s15 + $0x38] sm:$0xff] %vm568_vm2, %v2090_v2  ;;  %v1979_v0 = vadd.f32 %v3460_v25, %v1959_v14 }
 0x28e   : > { %v1761_v20 = vpop.f32.mrf.mxu2 }
 0x28f   : > { %v1995_v16 = vmax.f32 %v1979_v0, 0.0  ;;  %v1791_v23 = vadd.f32 %v1761_v20, %v1642_v26  ;;  %v1618_v32 = vpop.f32.mrf.mxu1 }
 0x290   : > { %v1644_v38 = vadd.f32 %v1618_v32, %v1494_v1 }
 0x291   : > { %v2075_v12 = vadd.f32 %v2036_v47, %v1995_v16  ;;  %v1940_v34 = vadd.f32 %v1910_v17, %v1791_v23 }
 0x293   : > { %v2091_v57 = vmax.f32 %v2075_v12, 0.0  ;;  %v1960_v21 = vmul.f32 %v3455_v6, %v1940_v34 }
 0x294   : > { %v1913_v50 = vpop.f32.mrf.mxu3 }
 0x295   : > { %2107 = vst.msk [vmem:[%s3470_s15 + $0x40] sm:$0xff] %vm568_vm2, %v2091_v57  ;;  %v1980_v59 = vadd.f32 %v3460_v25, %v1960_v21  ;;  %v2046_v21 = vpop.permute.xlu1 %2045 }
 0x296   : > { %v1764_v28 = vpop.f32.mrf.mxu2 }
 0x297   : > { %v1996_v11 = vmax.f32 %v1980_v59, 0.0  ;;  %v1792_v36 = vadd.f32 %v1764_v28, %v1643_v27  ;;  %v1621_v8 = vpop.f32.mrf.mxu1  ;;  %v1480_v27 = vpop.f32.mrf.mxu0 }
 0x298   : > { %v1645_v60 = vadd.f32 %v1621_v8, %v1495_v43  ;;  %v1498_v33 = vadd.f32 %v1480_v27, %v3447_v19 }
 0x299   : > { %v2076_v35 = vadd.f32 %v3445_v18, %v1996_v11  ;;  %v1941_v62 = vadd.f32 %v1913_v50, %v1792_v36 }
 0x29b   : > { %v2092_v7 = vmax.f32 %v2076_v35, 0.0  ;;  %v1961_v58 = vmul.f32 %v3455_v6, %v1941_v62 }
 0x29c   : > { %v1916_v41 = vpop.f32.mrf.mxu3 }
 0x29d   : > { %2108 = vst.msk [vmem:[%s3470_s15 + $0x48] sm:$0xff] %vm568_vm2, %v2092_v7  ;;  %v1981_v39 = vadd.f32 %v3460_v25, %v1961_v58  ;;  %v2048_v58 = vpop.permute.xlu2 %2047 }
 0x29e   : > { %v1767_v40 = vpop.f32.mrf.mxu2 }
 0x29f   : > { %v1997_v48 = vmax.f32 %v1981_v39, 0.0  ;;  %v1793_v61 = vadd.f32 %v1767_v40, %v1644_v38  ;;  %v1624_v52 = vpop.f32.mrf.mxu1 }
 0x2a0   : > { %v1646_v30 = vadd.f32 %v1624_v52, %v1496_v4 }
 0x2a1   : > { %v2077_v45 = vadd.f32 %v2040_v9, %v1997_v48  ;;  %v1942_v18 = vadd.f32 %v1916_v41, %v1793_v61  ;;  %v2050_v48 = vpop.permute.xlu0 %2049 }
 0x2a3   : > { %v2093_v63 = vmax.f32 %v2077_v45, 0.0  ;;  %v1962_v3 = vmul.f32 %v3455_v6, %v1942_v18 }
 0x2a4   : > { %v1919_v56 = vpop.f32.mrf.mxu3 }
 0x2a5   : > { %2109 = vst.msk [vmem:[%s3470_s15 + $0x50] sm:$0xff] %vm568_vm2, %v2093_v63  ;;  %v1982_v10 = vadd.f32 %v3460_v25, %v1962_v3 }
 0x2a6   : > { %v1770_v51 = vpop.f32.mrf.mxu2 }
 0x2a7   : > { %v1998_v55 = vmax.f32 %v1982_v10, 0.0  ;;  %v1794_v5 = vadd.f32 %v1770_v51, %v1645_v60  ;;  %v1627_v20 = vpop.f32.mrf.mxu1 }
 0x2a8   : > { %v1647_v47 = vadd.f32 %v1627_v20, %v1497_v22 }
 0x2a9   : > { %v2078_v24 = vadd.f32 %v2042_v15, %v1998_v55  ;;  %v1943_v29 = vadd.f32 %v1919_v56, %v1794_v5 }
 0x2ab   : > { %v2094_v13 = vmax.f32 %v2078_v24, 0.0  ;;  %v1963_v42 = vmul.f32 %v3455_v6, %v1943_v29 }
 0x2ac   : > { %v1922_v14 = vpop.f32.mrf.mxu3 }
 0x2ad   : > { %2110 = vst.msk [vmem:[%s3470_s15 + $0x58] sm:$0xff] %vm568_vm2, %v2094_v13  ;;  %v1983_v53 = vadd.f32 %v3460_v25, %v1963_v42 }
 0x2ae   : > { %v1773_v2 = vpop.f32.mrf.mxu2 }
 0x2af   : > { %v1999_v26 = vmax.f32 %v1983_v53, 0.0  ;;  %v1795_v0 = vadd.f32 %v1773_v2, %v1646_v30  ;;  %v1630_v28 = vpop.f32.mrf.mxu1 }
 0x2b0   : > { %v1648_v36 = vadd.f32 %v1630_v28, %v1498_v33 }
 0x2b1   : > { %v2079_v17 = vadd.f32 %v3450_v49, %v1999_v26  ;;  %v1944_v37 = vadd.f32 %v1922_v14, %v1795_v0 }
 0x2b3   : > { %v2095_v16 = vmax.f32 %v2079_v17, 0.0  ;;  %v1964_v23 = vmul.f32 %v3455_v6, %v1944_v37 }
 0x2b4   : > { %v1925_v32 = vpop.f32.mrf.mxu3 }
 0x2b5   : > { %2111 = vst.msk [vmem:[%s3470_s15 + $0x60] sm:$0xff] %vm568_vm2, %v2095_v16  ;;  %v1984_v12 = vadd.f32 %v3460_v25, %v1964_v23 }
 0x2b6   : > { %v1776_v34 = vpop.f32.mrf.mxu2 }
 0x2b7   : > { %v2000_v54 = vmax.f32 %v1984_v12, 0.0  ;;  %v1796_v57 = vadd.f32 %v1776_v34, %v1647_v47 }
 0x2b9   : > { %v2080_v59 = vadd.f32 %v2046_v21, %v2000_v54  ;;  %v1945_v49 = vadd.f32 %v1925_v32, %v1796_v57 }
 0x2bb   : > { %v2096_v50 = vmax.f32 %v2080_v59, 0.0  ;;  %v1965_v11 = vmul.f32 %v3455_v6, %v1945_v49 }
 0x2bc   : > { %v1928_v62 = vpop.f32.mrf.mxu3 }
 0x2bd   : > { %2112 = vst.msk [vmem:[%s3470_s15 + $0x68] sm:$0xff] %vm568_vm2, %v2096_v50  ;;  %v1985_v46 = vadd.f32 %v3460_v25, %v1965_v11 }
 0x2be   : > { %v1779_v35 = vpop.f32.mrf.mxu2 }
 0x2bf   : > { %v2001_v1 = vmax.f32 %v1985_v46, 0.0  ;;  %v1797_v7 = vadd.f32 %v1779_v35, %v1648_v36 }
 0x2c1   : > { %v2081_v8 = vadd.f32 %v2048_v58, %v2001_v1  ;;  %v1946_v38 = vadd.f32 %v1928_v62, %v1797_v7 }
 0x2c3   : > { %v2097_v19 = vmax.f32 %v2081_v8, 0.0  ;;  %v1966_v39 = vmul.f32 %v3455_v6, %v1946_v38 }
 0x2c5   : > { %2113 = vst.msk [vmem:[%s3470_s15 + $0x70] sm:$0xff] %vm568_vm2, %v2097_v19  ;;  %v1986_v40 = vadd.f32 %v3460_v25, %v1966_v39 }
 0x2c7   : > { %v2002_v41 = vmax.f32 %v1986_v40, 0.0 }
 0x2c9   : > { %v2082_v61 = vadd.f32 %v2050_v48, %v2002_v41 }
 0x2cb   : > { %v2098_v9 = vmax.f32 %v2082_v61, 0.0 }
 0x2cd   : > { %2114 = vst.msk [vmem:[%s3470_s15 + $0x78] sm:$0xff] %vm568_vm2, %v2098_v9 }
 0x2ce   : > { %2452 = shalt.err (!%p2449_p3)
}
 0x2cf   : > { %s2491_s13 = smov 128   ;;  %s2492_s15 = smov 8  }
 0x2d0   : > { %2378 = dma.vmem_to_hbm [thread:$0]  (%p2571_p5), %s2129_s9, 2048, %s2131_s21, %s2116_s28, %s2491_s13, %s2491_s13, %s2492_s15  }
 0x2d1 PF: > { %p2384_p4 = scmp.ge.s32.totalorder %s2487_s27, 2  ;;  %s2145_s18 = sand.u32 1, %s2475_s24  }
 0x2d2   : > { %s2146_s19 = scalar_lea.sflag [#allocation4], %s2145_s18 }
 0x2d3   : > { %p2381_p7 = pnand %p2384_p4, %p2575_p6 }
 0x2d5   : > { %p2382_p8 = pneg %p2381_p7 }
 0x2d7   : > { %2470 = dma.done.wait (%p2382_p8), %s2146_s19, 2048  }
 0x2d8   : > { %2472 = vsyncadd (%p2382_p8), %s2146_s19, 4294965248  ;;  %p17_p9 = scmp.ge.s32.totalorder %s2558_s30, 4   ;;  %s3630_s24 = smov %s2479_s25 }
 0x2d9   : > { %s3631_s25 = smov %s2483_s26  ;;  %s3632_s26 = smov %s2569_s10 }
 0x2da   : > { %s3633_s27 = smov %s2558_s30  ;;  %19 = sbr.rel (!%p17_p9) target bundleno = 3 (0x3), region = 86 }
 0x2df   :  { %2152 = vsyncpa [#allocation4], 1 }
 0x2e0   :  { %2154 = vsyncpa [#allocation4 + $0x1], 1 }

</bundles_post_ra>
